<compile_context>
chip_gen: v6e
topology: v6e:2x2x1
jax: 0.10.0
libtpu: 0.0.40
codegen_flags: <defaults>
</compile_context>

<pallas_src>
import functools
import math

import jax
import jax.numpy as jnp
from jax.experimental import pallas as pl
from jax.experimental.pallas import tpu as pltpu


def _layer_norm(h, scale, shift, eps=1e-5):
    mean = jnp.mean(h, axis=-1, keepdims=True)
    var = jnp.mean((h - mean) ** 2, axis=-1, keepdims=True)   # unbiased=False
    return scale * ((h - mean) * jax.lax.rsqrt(var + jnp.float32(eps))) + shift


def _gelu(u):
    c = jnp.float32(math.sqrt(2.0 / math.pi))
    return 0.5 * u * (1.0 + jnp.tanh(c * (u + 0.044715 * (u * u * u))))


def gpt_block_kernel(x_ref,
                     ln1s_ref, ln1b_ref, wq_ref, wk_ref, wv_ref, wo_ref, bo_ref,
                     ln2s_ref, ln2b_ref, w1_ref, b1_ref, w2_ref, b2_ref,
                     y_ref, x_sc,
                     *, num_heads):
    layer = pl.program_id(1)
    T, D = x_sc.shape
    H = num_heads
    bf16 = jnp.bfloat16

    # Load this batch item's embedded rows into the resident residual scratch.
    @pl.when(layer == 0)
    def _():
        x_sc[...] = x_ref[...].astype(jnp.float32)

    x = x_sc[...]                                                # (T, D) f32

    # ---- sublayer 1: LN1 + causal multi-head attention + residual ---------
    xn = _layer_norm(x, ln1s_ref[...], ln1b_ref[...]).astype(bf16)
    # Heads-batched projections: weights are pre-laid-out per head in the
    # wrapper, so Q/K/V & per-head splits are leading-dim (free) — no lane
    # slicing or in-kernel transposes.  Total MXU flops equal the fused form.
    xn_h = jnp.broadcast_to(xn[None, :, :], (H, T, D))           # (H, T, D)
    q = jnp.einsum('htd,hdk->htk', xn_h, wq_ref[...],
                   preferred_element_type=jnp.float32)           # (H, T, Dh), scale folded in Wq
    k = jnp.einsum('htd,hdk->htk', xn_h, wk_ref[...],
                   preferred_element_type=jnp.float32)
    v = jnp.einsum('htd,hdk->htk', xn_h, wv_ref[...],
                   preferred_element_type=jnp.float32)

    # Causal additive mask built in-kernel (cheap VPU work, no HBM mask DMA).
    # NOTE: every query row keeps its diagonal key, so the finite -1e30 fill is
    # safe (no fully-masked rows).
    row = jax.lax.broadcasted_iota(jnp.int32, (T, T), 0)
    col = jax.lax.broadcasted_iota(jnp.int32, (T, T), 1)
    mask_bias = jnp.where(col <= row, jnp.float32(0.0), jnp.float32(-1e30))

    s = jnp.einsum('hqd,hkd->hqk', q.astype(bf16), k.astype(bf16),
                   preferred_element_type=jnp.float32)           # (H, T, T)
    s = s + mask_bias[None, :, :]
    p = jnp.exp(s - jnp.max(s, axis=-1, keepdims=True))
    inv_denom = pl.reciprocal(jnp.sum(p, axis=-1, keepdims=True), approx=True)
    ctx = jnp.einsum('hqk,hkd->hqd', p.astype(bf16), v.astype(bf16),
                     preferred_element_type=jnp.float32) * inv_denom  # (H, T, Dh)
    attn_h = jnp.einsum('hqd,hdo->hqo', ctx.astype(bf16), wo_ref[...],
                        preferred_element_type=jnp.float32)      # (H, T, D)
    x1 = x + jnp.sum(attn_h, axis=0) + bo_ref[...]               # explicit bias add

    # ---- sublayer 2: LN2 + feed-forward (tanh GELU) + residual -------------
    xn2 = _layer_norm(x1, ln2s_ref[...], ln2b_ref[...]).astype(bf16)
    h1 = _gelu(jnp.dot(xn2, w1_ref[...], preferred_element_type=jnp.float32)
               + b1_ref[...])
    out = x1 + jnp.dot(h1.astype(bf16), w2_ref[...],
                       preferred_element_type=jnp.float32) + b2_ref[...]
    x_sc[...] = out                                              # carry to next layer

    @pl.when(layer == pl.num_programs(1) - 1)
    def _():
        y_ref[...] = out.astype(y_ref.dtype)


def lm_head_kernel(x_ref, lnfs_ref, lnfb_ref, whead_ref, logits_ref):
    xf = _layer_norm(x_ref[...].astype(jnp.float32), lnfs_ref[...], lnfb_ref[...])
    logits_ref[...] = jnp.dot(xf.astype(jnp.bfloat16), whead_ref[...],
                              preferred_element_type=jnp.float32
                              ).astype(logits_ref.dtype)


def gpt_forward(tok_ids, params, *, num_heads):
    tok_emb = params["tok_emb"]
    pos_emb = params["pos_emb"]
    blocks = params["blocks"]
    B, T = tok_ids.shape
    V, D = tok_emb.shape
    H = num_heads
    assert D % H == 0
    Dh = D // H
    L = blocks["wq"].shape[0]
    H4 = 4 * D
    BT = B * T
    bf16 = jnp.bfloat16

    # Embedding gather + (identity) dropout in plain JAX.
    x = tok_emb[tok_ids] + pos_emb[:T][None, :, :]               # (B, T, D)
    x2d = x.reshape(BT, D).astype(jnp.float32)

    # Wrapper-side (one-time) per-head weight layout + bf16 cast + scale fold.
    wq = ((blocks["wq"] * (1.0 / math.sqrt(Dh)))
          .reshape(L, D, H, Dh).transpose(0, 2, 1, 3).astype(bf16))   # (L,H,D,Dh)
    wk = blocks["wk"].reshape(L, D, H, Dh).transpose(0, 2, 1, 3).astype(bf16)
    wv = blocks["wv"].reshape(L, D, H, Dh).transpose(0, 2, 1, 3).astype(bf16)
    wo = blocks["wo"].reshape(L, H, Dh, D).astype(bf16)               # (L,H,Dh,D)
    w1 = blocks["w1"].astype(bf16)
    w2 = blocks["w2"].astype(bf16)
    whead = params["w_head"].astype(bf16)

    def per_layer(shape):   # per-layer stacked param; leading layer dim squeezed
        return pl.BlockSpec((None,) + shape,
                            lambda b, l, _s=shape: (l,) + (0,) * len(_s))

    block_kernel = functools.partial(gpt_block_kernel, num_heads=H)

    # Kernel 1: the whole layer stack.  grid = (batch tile [parallel, outer],
    # layer [arbitrary, inner]); residual stream lives in a VMEM scratch.
    # Per-layer weights are the only per-step HBM traffic (re-fetched once per
    # batch tile / per core — acceptable when tiles are large).
    x_final = pl.pallas_call(
        block_kernel,
        out_shape=jax.ShapeDtypeStruct((BT, D), jnp.float32),
        grid=(B, L),
        in_specs=[
            pl.BlockSpec((T, D), lambda b, l: (b, 0)),            # embedded rows
            per_layer((1, D)), per_layer((1, D)),                 # ln1 scale/shift
            per_layer((H, D, Dh)),                                # Wq (scaled)
            per_layer((H, D, Dh)),                                # Wk
            per_layer((H, D, Dh)),                                # Wv
            per_layer((H, Dh, D)), per_layer((1, D)),             # Wo, bo
            per_layer((1, D)), per_layer((1, D)),                 # ln2 scale/shift
            per_layer((D, H4)), per_layer((1, H4)),               # W1, b1
            per_layer((H4, D)), per_layer((1, D)),                # W2, b2
        ],
        out_specs=pl.BlockSpec((T, D), lambda b, l: (b, 0)),
        scratch_shapes=[pltpu.VMEM((T, D), jnp.float32)],
        compiler_params=pltpu.CompilerParams(
            dimension_semantics=("parallel", "arbitrary"),
            vmem_limit_bytes=32 * 1024 * 1024),
    )(
        x2d,
        blocks["ln1_s"], blocks["ln1_b"], wq, wk, wv, wo, blocks["bo"],
        blocks["ln2_s"], blocks["ln2_b"], w1, blocks["b1"], w2, blocks["b2"],
    )

    # Kernel 2: final LayerNorm + LM head, tiled over rows and vocab so the
    # (D, V) head weight is never resident during the layer loop.
    TR = BT if BT <= 128 else 128
    TV = V if V <= 512 else 512
    assert BT % TR == 0 and V % TV == 0 and TR % 8 == 0 and TV % 128 == 0
    logits2d = pl.pallas_call(
        lm_head_kernel,
        out_shape=jax.ShapeDtypeStruct((BT, V), jnp.float32),
        grid=(BT // TR, V // TV),
        in_specs=[
            pl.BlockSpec((TR, D), lambda i, j: (i, 0)),
            pl.BlockSpec((1, D), lambda i, j: (0, 0)),
            pl.BlockSpec((1, D), lambda i, j: (0, 0)),
            pl.BlockSpec((D, TV), lambda i, j: (0, j)),
        ],
        out_specs=pl.BlockSpec((TR, TV), lambda i, j: (i, j)),   # lane-dense stores
        compiler_params=pltpu.CompilerParams(
            dimension_semantics=("parallel", "parallel"),
            vmem_limit_bytes=32 * 1024 * 1024),
    )(x_final, params["lnf_s"], params["lnf_b"], whead)

    return logits2d.reshape(B, T, V)


def reference_gpt(tok_ids, params, *, num_heads):
    """Pure-JAX f32 reference mirroring the PyTorch GPTModel forward (eval mode)."""
    B, T = tok_ids.shape
    D = params["tok_emb"].shape[1]
    Dh = D // num_heads
    blocks = params["blocks"]
    L = blocks["wq"].shape[0]

    def ln(h, s, b):
        m = jnp.mean(h, -1, keepdims=True)
        v = jnp.mean((h - m) ** 2, -1, keepdims=True)
        return s * ((h - m) / jnp.sqrt(v + 1e-5)) + b

    def gelu(u):
        c = math.sqrt(2.0 / math.pi)
        return 0.5 * u * (1.0 + jnp.tanh(c * (u + 0.044715 * u ** 3)))

    x = params["tok_emb"][tok_ids] + params["pos_emb"][:T][None, :, :]
    mask = jnp.triu(jnp.ones((T, T), bool), k=1)
    for l in range(L):
        p = {kk: vv[l] for kk, vv in blocks.items()}
        xn = ln(x, p["ln1_s"], p["ln1_b"])
        q = (xn @ p["wq"]).reshape(B, T, num_heads, Dh).transpose(0, 2, 1, 3)
        k = (xn @ p["wk"]).reshape(B, T, num_heads, Dh).transpose(0, 2, 1, 3)
        v = (xn @ p["wv"]).reshape(B, T, num_heads, Dh).transpose(0, 2, 1, 3)
        s = jnp.einsum("bhqd,bhkd->bhqk", q, k)
        s = jnp.where(mask, -jnp.inf, s) / math.sqrt(Dh)
        w = jax.nn.softmax(s, axis=-1)
        ctx = jnp.einsum("bhqk,bhkd->bhqd", w, v).transpose(0, 2, 1, 3).reshape(B, T, D)
        x = x + (ctx @ p["wo"] + p["bo"])
        xn2 = ln(x, p["ln2_s"], p["ln2_b"])
        x = x + (gelu(xn2 @ p["w1"] + p["b1"]) @ p["w2"] + p["b2"])
    xf = ln(x, params["lnf_s"], params["lnf_b"])
    return xf @ params["w_head"]


def init_params(key, cfg):
    V, Tc, D, L = cfg["vocab_size"], cfg["context_length"], cfg["emb_dim"], cfg["n_layers"]
    H4 = 4 * D
    std = 0.02
    keys = jax.random.split(key, 4 + L)

    def rnd(k, shape):
        return std * jax.random.normal(k, shape, jnp.float32)

    tok_emb = rnd(keys[0], (V, D))
    pos_emb = rnd(keys[1], (Tc, D))

    blocks = []
    for l in range(L):
        kk = jax.random.split(keys[4 + l], 13)
        blocks.append(dict(
            ln1_s=1.0 + 0.1 * jax.random.normal(kk[0], (1, D), jnp.float32),
            ln1_b=0.1 * jax.random.normal(kk[1], (1, D), jnp.float32),
            wq=rnd(kk[2], (D, D)),
            wk=rnd(kk[3], (D, D)),
            wv=rnd(kk[4], (D, D)),
            wo=rnd(kk[5], (D, D)),
            bo=0.1 * jax.random.normal(kk[6], (1, D), jnp.float32),
            ln2_s=1.0 + 0.1 * jax.random.normal(kk[7], (1, D), jnp.float32),
            ln2_b=0.1 * jax.random.normal(kk[8], (1, D), jnp.float32),
            w1=rnd(kk[9], (D, H4)),
            b1=0.1 * jax.random.normal(kk[10], (1, H4), jnp.float32),
            w2=rnd(kk[11], (H4, D)),
            b2=0.1 * jax.random.normal(kk[12], (1, D), jnp.float32),
        ))
    stacked = {k: jnp.stack([b[k] for b in blocks]) for k in blocks[0]}

    return dict(
        tok_emb=tok_emb, pos_emb=pos_emb, blocks=stacked,
        lnf_s=1.0 + 0.1 * jax.random.normal(keys[2], (1, D), jnp.float32),
        lnf_b=0.1 * jax.random.normal(jax.random.fold_in(keys[2], 1), (1, D), jnp.float32),
        w_head=rnd(keys[3], (D, V)),
    )


if __name__ == "__main__":
    cfg = dict(vocab_size=128, context_length=8, emb_dim=32, n_heads=4,
               n_layers=2, drop_rate=0.0, qkv_bias=False)
    B, T = 2, 8

    key = jax.random.PRNGKey(0)
    pkey, dkey = jax.random.split(key)
    params = init_params(pkey, cfg)
    tok_ids = jax.random.randint(dkey, (B, T), 0, cfg["vocab_size"], dtype=jnp.int32)

    logits = gpt_forward(tok_ids, params, num_heads=cfg["n_heads"])
    logits = jax.block_until_ready(logits)

    ref = reference_gpt(tok_ids, params, num_heads=cfg["n_heads"])
    assert logits.shape == (B, T, cfg["vocab_size"])
    # Tolerance accounts for bf16 MXU operands and pl.reciprocal(approx=True)
    # in the softmax denominator (deliberate precision trades vs the f32 ref).
    err = float(jnp.max(jnp.abs(logits - ref)))
    assert jnp.allclose(logits, ref, atol=2e-2, rtol=2e-2), f"max abs err = {err}"

    print("KERNEL_OK")
</pallas_src>

<mosaic_0001>
module attributes {stable_mosaic.version = 11 : i64} {
  func.func @gpt_block_kernel(%arg0: i32, %arg1: i32, %arg2: memref<8x32xf32, #tpu.memory_space<vmem>>, %arg3: memref<1x1x32xf32, #tpu.memory_space<vmem>>, %arg4: memref<1x1x32xf32, #tpu.memory_space<vmem>>, %arg5: memref<1x4x32x8xbf16, #tpu.memory_space<vmem>>, %arg6: memref<1x4x32x8xbf16, #tpu.memory_space<vmem>>, %arg7: memref<1x4x32x8xbf16, #tpu.memory_space<vmem>>, %arg8: memref<1x4x8x32xbf16, #tpu.memory_space<vmem>>, %arg9: memref<1x1x32xf32, #tpu.memory_space<vmem>>, %arg10: memref<1x1x32xf32, #tpu.memory_space<vmem>>, %arg11: memref<1x1x32xf32, #tpu.memory_space<vmem>>, %arg12: memref<1x32x128xbf16, #tpu.memory_space<vmem>>, %arg13: memref<1x1x128xf32, #tpu.memory_space<vmem>>, %arg14: memref<1x128x32xbf16, #tpu.memory_space<vmem>>, %arg15: memref<1x1x32xf32, #tpu.memory_space<vmem>>, %arg16: memref<8x32xf32, #tpu.memory_space<vmem>>, %arg17: memref<8x32xf32, #tpu.memory_space<vmem>>) attributes {dimension_semantics = [#tpu.dimension_semantics<parallel>, #tpu.dimension_semantics<arbitrary>], iteration_bounds = array<i64: 2, 2>, scalar_prefetch = 0 : i64, scratch_operands = 1 : i64, tpu.core_type = #tpu.core_type<tc>, window_params = [{transform_indices = @transform_0, window_bounds = array<i64: 8, 32>}, {transform_indices = @transform_1, window_bounds = array<i64: 1, 1, 32>}, {transform_indices = @transform_2, window_bounds = array<i64: 1, 1, 32>}, {transform_indices = @transform_3, window_bounds = array<i64: 1, 4, 32, 8>}, {transform_indices = @transform_4, window_bounds = array<i64: 1, 4, 32, 8>}, {transform_indices = @transform_5, window_bounds = array<i64: 1, 4, 32, 8>}, {transform_indices = @transform_6, window_bounds = array<i64: 1, 4, 8, 32>}, {transform_indices = @transform_7, window_bounds = array<i64: 1, 1, 32>}, {transform_indices = @transform_8, window_bounds = array<i64: 1, 1, 32>}, {transform_indices = @transform_9, window_bounds = array<i64: 1, 1, 32>}, {transform_indices = @transform_10, window_bounds = array<i64: 1, 32, 128>}, {transform_indices = @transform_11, window_bounds = array<i64: 1, 1, 128>}, {transform_indices = @transform_12, window_bounds = array<i64: 1, 128, 32>}, {transform_indices = @transform_13, window_bounds = array<i64: 1, 1, 32>}, {transform_indices = @transform_14, window_bounds = array<i64: 8, 32>}]} {
    %c0_i32 = arith.constant 0 : i32
    %0 = arith.cmpi eq, %arg1, %c0_i32 : i32
    %1 = arith.extui %0 : i1 to i32
    %c0_i32_0 = arith.constant 0 : i32
    %2 = arith.cmpi ne, %1, %c0_i32_0 : i32
    scf.if %2 {
      %c0_74 = arith.constant 0 : index
      %c0_75 = arith.constant 0 : index
      %138 = vector.load %arg2[%c0_74, %c0_75] : memref<8x32xf32, #tpu.memory_space<vmem>>, vector<8x32xf32>
      %c0_76 = arith.constant 0 : index
      %c0_77 = arith.constant 0 : index
      %139 = vector.load %arg17[%c0_76, %c0_77] : memref<8x32xf32, #tpu.memory_space<vmem>>, vector<8x32xf32>
      tpu.vector_store %arg17[%c0_76, %c0_77], %138 {strides = array<i32>} : memref<8x32xf32, #tpu.memory_space<vmem>>, vector<8x32xf32>,
    } else {
    }
    %c0 = arith.constant 0 : index
    %c0_1 = arith.constant 0 : index
    %3 = vector.load %arg17[%c0, %c0_1] : memref<8x32xf32, #tpu.memory_space<vmem>>, vector<8x32xf32>
    %c0_2 = arith.constant 0 : index
    %c0_3 = arith.constant 0 : index
    %c0_4 = arith.constant 0 : index
    %4 = vector.load %arg3[%c0_2, %c0_3, %c0_4] : memref<1x1x32xf32, #tpu.memory_space<vmem>>, vector<1x1x32xf32>
    %5 = vector.shape_cast %4 : vector<1x1x32xf32> to vector<1x32xf32>
    %c0_5 = arith.constant 0 : index
    %c0_6 = arith.constant 0 : index
    %c0_7 = arith.constant 0 : index
    %6 = vector.load %arg4[%c0_5, %c0_6, %c0_7] : memref<1x1x32xf32, #tpu.memory_space<vmem>>, vector<1x1x32xf32>
    %7 = vector.shape_cast %6 : vector<1x1x32xf32> to vector<1x32xf32>
    %cst = arith.constant dense<0.000000e+00> : vector<8xf32>
    %8 = vector.multi_reduction <add>, %3, %cst [1] : vector<8x32xf32> to vector<8xf32>
    %9 = vector.shape_cast %8 : vector<8xf32> to vector<8x1xf32>
    %cst_8 = arith.constant 3.200000e+01 : f32
    %10 = vector.broadcast %cst_8 : f32 to vector<8x1xf32>
    %11 = arith.divf %9, %10 : vector<8x1xf32>
    %12 = vector.broadcast %11 : vector<8x1xf32> to vector<8x32xf32>
    %13 = arith.subf %3, %12 : vector<8x32xf32>
    %14 = arith.mulf %13, %13 : vector<8x32xf32>
    %cst_9 = arith.constant dense<0.000000e+00> : vector<8xf32>
    %15 = vector.multi_reduction <add>, %14, %cst_9 [1] : vector<8x32xf32> to vector<8xf32>
    %16 = vector.shape_cast %15 : vector<8xf32> to vector<8x1xf32>
    %cst_10 = arith.constant 3.200000e+01 : f32
    %17 = vector.broadcast %cst_10 : f32 to vector<8x1xf32>
    %18 = arith.divf %16, %17 : vector<8x1xf32>
    %19 = vector.broadcast %11 : vector<8x1xf32> to vector<8x32xf32>
    %20 = arith.subf %3, %19 : vector<8x32xf32>
    %cst_11 = arith.constant 9.99999974E-6 : f32
    %21 = vector.broadcast %cst_11 : f32 to vector<8x1xf32>
    %22 = arith.addf %18, %21 : vector<8x1xf32>
    %23 = math.rsqrt %22 : vector<8x1xf32>
    %24 = vector.broadcast %23 : vector<8x1xf32> to vector<8x32xf32>
    %25 = arith.mulf %20, %24 : vector<8x32xf32>
    %26 = vector.broadcast %5 : vector<1x32xf32> to vector<8x32xf32>
    %27 = arith.mulf %26, %25 : vector<8x32xf32>
    %28 = vector.broadcast %7 : vector<1x32xf32> to vector<8x32xf32>
    %29 = arith.addf %27, %28 : vector<8x32xf32>
    %30 = arith.truncf %29 : vector<8x32xf32> to vector<8x32xbf16>
    %31 = vector.shape_cast %30 : vector<8x32xbf16> to vector<1x8x32xbf16>
    %32 = vector.shape_cast %31 : vector<1x8x32xbf16> to vector<1x8x32xbf16>
    %33 = vector.broadcast %32 : vector<1x8x32xbf16> to vector<4x8x32xbf16>
    %c0_12 = arith.constant 0 : index
    %c0_13 = arith.constant 0 : index
    %c0_14 = arith.constant 0 : index
    %c0_15 = arith.constant 0 : index
    %34 = vector.load %arg5[%c0_12, %c0_13, %c0_14, %c0_15] : memref<1x4x32x8xbf16, #tpu.memory_space<vmem>>, vector<1x4x32x8xbf16>
    %35 = vector.shape_cast %34 : vector<1x4x32x8xbf16> to vector<4x32x8xbf16>
    "tpu.trace_start"() <{level = 10 : i32, message = "htd,hdk->htk"}> : () -> ()
    %cst_16 = arith.constant dense<0.000000e+00> : vector<4x8x8xf32>
    %36 = tpu.matmul %33, %35, %cst_16 {dimension_numbers = #tpu.dot_dimension_numbers<[2], [1], [1], [2], [0, 0, 0, 1, 1, 2], [0], [0]>} : vector<4x8x32xbf16>, vector<4x32x8xbf16>, vector<4x8x8xf32> -> vector<4x8x8xf32>
    "tpu.trace_stop"() : () -> ()
    %c0_17 = arith.constant 0 : index
    %c0_18 = arith.constant 0 : index
    %c0_19 = arith.constant 0 : index
    %c0_20 = arith.constant 0 : index
    %37 = vector.load %arg6[%c0_17, %c0_18, %c0_19, %c0_20] : memref<1x4x32x8xbf16, #tpu.memory_space<vmem>>, vector<1x4x32x8xbf16>
    %38 = vector.shape_cast %37 : vector<1x4x32x8xbf16> to vector<4x32x8xbf16>
    "tpu.trace_start"() <{level = 10 : i32, message = "htd,hdk->htk"}> : () -> ()
    %cst_21 = arith.constant dense<0.000000e+00> : vector<4x8x8xf32>
    %39 = tpu.matmul %33, %38, %cst_21 {dimension_numbers = #tpu.dot_dimension_numbers<[2], [1], [1], [2], [0, 0, 0, 1, 1, 2], [0], [0]>} : vector<4x8x32xbf16>, vector<4x32x8xbf16>, vector<4x8x8xf32> -> vector<4x8x8xf32>
    "tpu.trace_stop"() : () -> ()
    %c0_22 = arith.constant 0 : index
    %c0_23 = arith.constant 0 : index
    %c0_24 = arith.constant 0 : index
    %c0_25 = arith.constant 0 : index
    %40 = vector.load %arg7[%c0_22, %c0_23, %c0_24, %c0_25] : memref<1x4x32x8xbf16, #tpu.memory_space<vmem>>, vector<1x4x32x8xbf16>
    %41 = vector.shape_cast %40 : vector<1x4x32x8xbf16> to vector<4x32x8xbf16>
    "tpu.trace_start"() <{level = 10 : i32, message = "htd,hdk->htk"}> : () -> ()
    %cst_26 = arith.constant dense<0.000000e+00> : vector<4x8x8xf32>
    %42 = tpu.matmul %33, %41, %cst_26 {dimension_numbers = #tpu.dot_dimension_numbers<[2], [1], [1], [2], [0, 0, 0, 1, 1, 2], [0], [0]>} : vector<4x8x32xbf16>, vector<4x32x8xbf16>, vector<4x8x8xf32> -> vector<4x8x8xf32>
    "tpu.trace_stop"() : () -> ()
    %43 = tpu.iota {dimensions = array<i32: 0>} : vector<8x8xi32>
    %44 = tpu.iota {dimensions = array<i32: 1>} : vector<8x8xi32>
    %45 = arith.cmpi sle, %44, %43 : vector<8x8xi32>
    %cst_27 = arith.constant 0.000000e+00 : f32
    %cst_28 = arith.constant -1.000000e+30 : f32
    %46 = vector.broadcast %cst_27 : f32 to vector<8x8xf32>
    %47 = vector.broadcast %cst_28 : f32 to vector<8x8xf32>
    %48 = arith.select %45, %46, %47 : vector<8x8xi1>, vector<8x8xf32>
    %49 = arith.truncf %36 : vector<4x8x8xf32> to vector<4x8x8xbf16>
    %50 = arith.truncf %39 : vector<4x8x8xf32> to vector<4x8x8xbf16>
    "tpu.trace_start"() <{level = 10 : i32, message = "hqd,hkd->hqk"}> : () -> ()
    %cst_29 = arith.constant dense<0.000000e+00> : vector<4x8x8xf32>
    %51 = tpu.matmul %49, %50, %cst_29 {dimension_numbers = #tpu.dot_dimension_numbers<[2], [2], [1], [1], [0, 0, 0, 1, 1, 1], [0], [0]>} : vector<4x8x8xbf16>, vector<4x8x8xbf16>, vector<4x8x8xf32> -> vector<4x8x8xf32>
    "tpu.trace_stop"() : () -> ()
    %52 = vector.shape_cast %48 : vector<8x8xf32> to vector<1x8x8xf32>
    %53 = vector.broadcast %52 : vector<1x8x8xf32> to vector<4x8x8xf32>
    %54 = arith.addf %51, %53 : vector<4x8x8xf32>
    %cst_30 = arith.constant dense<0xFF800000> : vector<4x8xf32>
    %55 = vector.multi_reduction <maximumf>, %54, %cst_30 [2] : vector<4x8x8xf32> to vector<4x8xf32>
    %56 = vector.shape_cast %55 : vector<4x8xf32> to vector<4x8x1xf32>
    %57 = vector.broadcast %56 : vector<4x8x1xf32> to vector<4x8x8xf32>
    %58 = arith.subf %54, %57 : vector<4x8x8xf32>
    %59 = math.exp %58 : vector<4x8x8xf32>
    %cst_31 = arith.constant dense<0.000000e+00> : vector<4x8xf32>
    %60 = vector.multi_reduction <add>, %59, %cst_31 [2] : vector<4x8x8xf32> to vector<4x8xf32>
    %61 = vector.shape_cast %60 : vector<4x8xf32> to vector<4x8x1xf32>
    %62 = tpu.reciprocal %61 {approx = true} : vector<4x8x1xf32> -> vector<4x8x1xf32>
    %63 = arith.truncf %59 : vector<4x8x8xf32> to vector<4x8x8xbf16>
    %64 = arith.truncf %42 : vector<4x8x8xf32> to vector<4x8x8xbf16>
    "tpu.trace_start"() <{level = 10 : i32, message = "hqk,hkd->hqd"}> : () -> ()
    %cst_32 = arith.constant dense<0.000000e+00> : vector<4x8x8xf32>
    %65 = tpu.matmul %63, %64, %cst_32 {dimension_numbers = #tpu.dot_dimension_numbers<[2], [1], [1], [2], [0, 0, 0, 1, 1, 2], [0], [0]>} : vector<4x8x8xbf16>, vector<4x8x8xbf16>, vector<4x8x8xf32> -> vector<4x8x8xf32>
    "tpu.trace_stop"() : () -> ()
    %66 = vector.broadcast %62 : vector<4x8x1xf32> to vector<4x8x8xf32>
    %67 = arith.mulf %65, %66 : vector<4x8x8xf32>
    %68 = arith.truncf %67 : vector<4x8x8xf32> to vector<4x8x8xbf16>
    %c0_33 = arith.constant 0 : index
    %c0_34 = arith.constant 0 : index
    %c0_35 = arith.constant 0 : index
    %c0_36 = arith.constant 0 : index
    %69 = vector.load %arg8[%c0_33, %c0_34, %c0_35, %c0_36] : memref<1x4x8x32xbf16, #tpu.memory_space<vmem>>, vector<1x4x8x32xbf16>
    %70 = vector.shape_cast %69 : vector<1x4x8x32xbf16> to vector<4x8x32xbf16>
    "tpu.trace_start"() <{level = 10 : i32, message = "hqd,hdo->hqo"}> : () -> ()
    %cst_37 = arith.constant dense<0.000000e+00> : vector<4x8x32xf32>
    %71 = tpu.matmul %68, %70, %cst_37 {dimension_numbers = #tpu.dot_dimension_numbers<[2], [1], [1], [2], [0, 0, 0, 1, 1, 2], [0], [0]>} : vector<4x8x8xbf16>, vector<4x8x32xbf16>, vector<4x8x32xf32> -> vector<4x8x32xf32>
    "tpu.trace_stop"() : () -> ()
    %cst_38 = arith.constant dense<0.000000e+00> : vector<8x32xf32>
    %72 = vector.multi_reduction <add>, %71, %cst_38 [0] : vector<4x8x32xf32> to vector<8x32xf32>
    %73 = arith.addf %3, %72 : vector<8x32xf32>
    %c0_39 = arith.constant 0 : index
    %c0_40 = arith.constant 0 : index
    %c0_41 = arith.constant 0 : index
    %74 = vector.load %arg9[%c0_39, %c0_40, %c0_41] : memref<1x1x32xf32, #tpu.memory_space<vmem>>, vector<1x1x32xf32>
    %75 = vector.shape_cast %74 : vector<1x1x32xf32> to vector<1x32xf32>
    %76 = vector.broadcast %75 : vector<1x32xf32> to vector<8x32xf32>
    %77 = arith.addf %73, %76 : vector<8x32xf32>
    %c0_42 = arith.constant 0 : index
    %c0_43 = arith.constant 0 : index
    %c0_44 = arith.constant 0 : index
    %78 = vector.load %arg10[%c0_42, %c0_43, %c0_44] : memref<1x1x32xf32, #tpu.memory_space<vmem>>, vector<1x1x32xf32>
    %79 = vector.shape_cast %78 : vector<1x1x32xf32> to vector<1x32xf32>
    %c0_45 = arith.constant 0 : index
    %c0_46 = arith.constant 0 : index
    %c0_47 = arith.constant 0 : index
    %80 = vector.load %arg11[%c0_45, %c0_46, %c0_47] : memref<1x1x32xf32, #tpu.memory_space<vmem>>, vector<1x1x32xf32>
    %81 = vector.shape_cast %80 : vector<1x1x32xf32> to vector<1x32xf32>
    %cst_48 = arith.constant dense<0.000000e+00> : vector<8xf32>
    %82 = vector.multi_reduction <add>, %77, %cst_48 [1] : vector<8x32xf32> to vector<8xf32>
    %83 = vector.shape_cast %82 : vector<8xf32> to vector<8x1xf32>
    %cst_49 = arith.constant 3.200000e+01 : f32
    %84 = vector.broadcast %cst_49 : f32 to vector<8x1xf32>
    %85 = arith.divf %83, %84 : vector<8x1xf32>
    %86 = vector.broadcast %85 : vector<8x1xf32> to vector<8x32xf32>
    %87 = arith.subf %77, %86 : vector<8x32xf32>
    %88 = arith.mulf %87, %87 : vector<8x32xf32>
    %cst_50 = arith.constant dense<0.000000e+00> : vector<8xf32>
    %89 = vector.multi_reduction <add>, %88, %cst_50 [1] : vector<8x32xf32> to vector<8xf32>
    %90 = vector.shape_cast %89 : vector<8xf32> to vector<8x1xf32>
    %cst_51 = arith.constant 3.200000e+01 : f32
    %91 = vector.broadcast %cst_51 : f32 to vector<8x1xf32>
    %92 = arith.divf %90, %91 : vector<8x1xf32>
    %93 = vector.broadcast %85 : vector<8x1xf32> to vector<8x32xf32>
    %94 = arith.subf %77, %93 : vector<8x32xf32>
    %cst_52 = arith.constant 9.99999974E-6 : f32
    %95 = vector.broadcast %cst_52 : f32 to vector<8x1xf32>
    %96 = arith.addf %92, %95 : vector<8x1xf32>
    %97 = math.rsqrt %96 : vector<8x1xf32>
    %98 = vector.broadcast %97 : vector<8x1xf32> to vector<8x32xf32>
    %99 = arith.mulf %94, %98 : vector<8x32xf32>
    %100 = vector.broadcast %79 : vector<1x32xf32> to vector<8x32xf32>
    %101 = arith.mulf %100, %99 : vector<8x32xf32>
    %102 = vector.broadcast %81 : vector<1x32xf32> to vector<8x32xf32>
    %103 = arith.addf %101, %102 : vector<8x32xf32>
    %104 = arith.truncf %103 : vector<8x32xf32> to vector<8x32xbf16>
    %c0_53 = arith.constant 0 : index
    %c0_54 = arith.constant 0 : index
    %c0_55 = arith.constant 0 : index
    %105 = vector.load %arg12[%c0_53, %c0_54, %c0_55] : memref<1x32x128xbf16, #tpu.memory_space<vmem>>, vector<1x32x128xbf16>
    %106 = vector.shape_cast %105 : vector<1x32x128xbf16> to vector<32x128xbf16>
    %cst_56 = arith.constant dense<0.000000e+00> : vector<8x128xf32>
    %107 = tpu.matmul %104, %106, %cst_56 {dimension_numbers = #tpu.dot_dimension_numbers<[1], [0], [0], [1], [0, 0, 1, 1], [], []>} : vector<8x32xbf16>, vector<32x128xbf16>, vector<8x128xf32> -> vector<8x128xf32>
    %c0_57 = arith.constant 0 : index
    %c0_58 = arith.constant 0 : index
    %c0_59 = arith.constant 0 : index
    %108 = vector.load %arg13[%c0_57, %c0_58, %c0_59] : memref<1x1x128xf32, #tpu.memory_space<vmem>>, vector<1x1x128xf32>
    %109 = vector.shape_cast %108 : vector<1x1x128xf32> to vector<1x128xf32>
    %110 = vector.broadcast %109 : vector<1x128xf32> to vector<8x128xf32>
    %111 = arith.addf %107, %110 : vector<8x128xf32>
    %cst_60 = arith.constant 5.000000e-01 : f32
    %112 = vector.broadcast %cst_60 : f32 to vector<8x128xf32>
    %113 = arith.mulf %112, %111 : vector<8x128xf32>
    %114 = arith.mulf %111, %111 : vector<8x128xf32>
    %115 = arith.mulf %114, %111 : vector<8x128xf32>
    %cst_61 = arith.constant 4.471500e-02 : f32
    %116 = vector.broadcast %cst_61 : f32 to vector<8x128xf32>
    %117 = arith.mulf %116, %115 : vector<8x128xf32>
    %118 = arith.addf %111, %117 : vector<8x128xf32>
    %cst_62 = arith.constant 0.797884583 : f32
    %119 = vector.broadcast %cst_62 : f32 to vector<8x128xf32>
    %120 = arith.mulf %119, %118 : vector<8x128xf32>
    %121 = math.tanh %120 : vector<8x128xf32>
    %cst_63 = arith.constant 1.000000e+00 : f32
    %122 = vector.broadcast %cst_63 : f32 to vector<8x128xf32>
    %123 = arith.addf %122, %121 : vector<8x128xf32>
    %124 = arith.mulf %113, %123 : vector<8x128xf32>
    %125 = arith.truncf %124 : vector<8x128xf32> to vector<8x128xbf16>
    %c0_64 = arith.constant 0 : index
    %c0_65 = arith.constant 0 : index
    %c0_66 = arith.constant 0 : index
    %126 = vector.load %arg14[%c0_64, %c0_65, %c0_66] : memref<1x128x32xbf16, #tpu.memory_space<vmem>>, vector<1x128x32xbf16>
    %127 = vector.shape_cast %126 : vector<1x128x32xbf16> to vector<128x32xbf16>
    %cst_67 = arith.constant dense<0.000000e+00> : vector<8x32xf32>
    %128 = tpu.matmul %125, %127, %cst_67 {dimension_numbers = #tpu.dot_dimension_numbers<[1], [0], [0], [1], [0, 0, 1, 1], [], []>} : vector<8x128xbf16>, vector<128x32xbf16>, vector<8x32xf32> -> vector<8x32xf32>
    %129 = arith.addf %77, %128 : vector<8x32xf32>
    %c0_68 = arith.constant 0 : index
    %c0_69 = arith.constant 0 : index
    %c0_70 = arith.constant 0 : index
    %130 = vector.load %arg15[%c0_68, %c0_69, %c0_70] : memref<1x1x32xf32, #tpu.memory_space<vmem>>, vector<1x1x32xf32>
    %131 = vector.shape_cast %130 : vector<1x1x32xf32> to vector<1x32xf32>
    %132 = vector.broadcast %131 : vector<1x32xf32> to vector<8x32xf32>
    %133 = arith.addf %129, %132 : vector<8x32xf32>
    %c0_71 = arith.constant 0 : index
    %c0_72 = arith.constant 0 : index
    %134 = vector.load %arg17[%c0_71, %c0_72] : memref<8x32xf32, #tpu.memory_space<vmem>>, vector<8x32xf32>
    tpu.vector_store %arg17[%c0_71, %c0_72], %133 {strides = array<i32>} : memref<8x32xf32, #tpu.memory_space<vmem>>, vector<8x32xf32>,
    %c1_i32 = arith.constant 1 : i32
    %135 = arith.cmpi eq, %arg1, %c1_i32 : i32
    %136 = arith.extui %135 : i1 to i32
    %c0_i32_73 = arith.constant 0 : i32
    %137 = arith.cmpi ne, %136, %c0_i32_73 : i32
    scf.if %137 {
      %c0_74 = arith.constant 0 : index
      %c0_75 = arith.constant 0 : index
      %138 = vector.load %arg16[%c0_74, %c0_75] : memref<8x32xf32, #tpu.memory_space<vmem>>, vector<8x32xf32>
      tpu.vector_store %arg16[%c0_74, %c0_75], %133 {strides = array<i32>} : memref<8x32xf32, #tpu.memory_space<vmem>>, vector<8x32xf32>,
    } else {
    }
    return
  }
  func.func @transform_0(%arg0: i32, %arg1: i32) -> (i32, i32) {
    %c0_i32 = arith.constant 0 : i32
    %c0_i32_0 = arith.constant 0 : i32
    return %arg0, %c0_i32 : i32, i32
  }
  func.func @transform_1(%arg0: i32, %arg1: i32) -> (i32, i32, i32) {
    %c0_i32 = arith.constant 0 : i32
    %c0_i32_0 = arith.constant 0 : i32
    %c0_i32_1 = arith.constant 0 : i32
    return %arg1, %c0_i32, %c0_i32_0 : i32, i32, i32
  }
  func.func @transform_2(%arg0: i32, %arg1: i32) -> (i32, i32, i32) {
    %c0_i32 = arith.constant 0 : i32
    %c0_i32_0 = arith.constant 0 : i32
    %c0_i32_1 = arith.constant 0 : i32
    return %arg1, %c0_i32, %c0_i32_0 : i32, i32, i32
  }
  func.func @transform_3(%arg0: i32, %arg1: i32) -> (i32, i32, i32, i32) {
    %c0_i32 = arith.constant 0 : i32
    %c0_i32_0 = arith.constant 0 : i32
    %c0_i32_1 = arith.constant 0 : i32
    %c0_i32_2 = arith.constant 0 : i32
    return %arg1, %c0_i32, %c0_i32_0, %c0_i32_1 : i32, i32, i32, i32
  }
  func.func @transform_4(%arg0: i32, %arg1: i32) -> (i32, i32, i32, i32) {
    %c0_i32 = arith.constant 0 : i32
    %c0_i32_0 = arith.constant 0 : i32
    %c0_i32_1 = arith.constant 0 : i32
    %c0_i32_2 = arith.constant 0 : i32
    return %arg1, %c0_i32, %c0_i32_0, %c0_i32_1 : i32, i32, i32, i32
  }
  func.func @transform_5(%arg0: i32, %arg1: i32) -> (i32, i32, i32, i32) {
    %c0_i32 = arith.constant 0 : i32
    %c0_i32_0 = arith.constant 0 : i32
    %c0_i32_1 = arith.constant 0 : i32
    %c0_i32_2 = arith.constant 0 : i32
    return %arg1, %c0_i32, %c0_i32_0, %c0_i32_1 : i32, i32, i32, i32
  }
  func.func @transform_6(%arg0: i32, %arg1: i32) -> (i32, i32, i32, i32) {
    %c0_i32 = arith.constant 0 : i32
    %c0_i32_0 = arith.constant 0 : i32
    %c0_i32_1 = arith.constant 0 : i32
    %c0_i32_2 = arith.constant 0 : i32
    return %arg1, %c0_i32, %c0_i32_0, %c0_i32_1 : i32, i32, i32, i32
  }
  func.func @transform_7(%arg0: i32, %arg1: i32) -> (i32, i32, i32) {
    %c0_i32 = arith.constant 0 : i32
    %c0_i32_0 = arith.constant 0 : i32
    %c0_i32_1 = arith.constant 0 : i32
    return %arg1, %c0_i32, %c0_i32_0 : i32, i32, i32
  }
  func.func @transform_8(%arg0: i32, %arg1: i32) -> (i32, i32, i32) {
    %c0_i32 = arith.constant 0 : i32
    %c0_i32_0 = arith.constant 0 : i32
    %c0_i32_1 = arith.constant 0 : i32
    return %arg1, %c0_i32, %c0_i32_0 : i32, i32, i32
  }
  func.func @transform_9(%arg0: i32, %arg1: i32) -> (i32, i32, i32) {
    %c0_i32 = arith.constant 0 : i32
    %c0_i32_0 = arith.constant 0 : i32
    %c0_i32_1 = arith.constant 0 : i32
    return %arg1, %c0_i32, %c0_i32_0 : i32, i32, i32
  }
  func.func @transform_10(%arg0: i32, %arg1: i32) -> (i32, i32, i32) {
    %c0_i32 = arith.constant 0 : i32
    %c0_i32_0 = arith.constant 0 : i32
    %c0_i32_1 = arith.constant 0 : i32
    return %arg1, %c0_i32, %c0_i32_0 : i32, i32, i32
  }
  func.func @transform_11(%arg0: i32, %arg1: i32) -> (i32, i32, i32) {
    %c0_i32 = arith.constant 0 : i32
    %c0_i32_0 = arith.constant 0 : i32
    %c0_i32_1 = arith.constant 0 : i32
    return %arg1, %c0_i32, %c0_i32_0 : i32, i32, i32
  }
  func.func @transform_12(%arg0: i32, %arg1: i32) -> (i32, i32, i32) {
    %c0_i32 = arith.constant 0 : i32
    %c0_i32_0 = arith.constant 0 : i32
    %c0_i32_1 = arith.constant 0 : i32
    return %arg1, %c0_i32, %c0_i32_0 : i32, i32, i32
  }
  func.func @transform_13(%arg0: i32, %arg1: i32) -> (i32, i32, i32) {
    %c0_i32 = arith.constant 0 : i32
    %c0_i32_0 = arith.constant 0 : i32
    %c0_i32_1 = arith.constant 0 : i32
    return %arg1, %c0_i32, %c0_i32_0 : i32, i32, i32
  }
  func.func @transform_14(%arg0: i32, %arg1: i32) -> (i32, i32) {
    %c0_i32 = arith.constant 0 : i32
    %c0_i32_0 = arith.constant 0 : i32
    return %arg0, %c0_i32 : i32, i32
  }
}

</mosaic_0001>

<bundles_post_ra>
// kernel: tpu_custom_call.1
= control target key start
LH: loop header
LB: loop body
LE: loop exit
PB: predicated region body
PF: predicated region fallthrough
CT: control target
= control target key end

     0   :  { %s3619_s0 = inlined_call_operand.vmem [shape: f32[16,32], index: 0, kind: input, shape index: {}]   ;;  %s3620_s1 = inlined_call_operand.vmem [shape: f32[2,1,32], index: 1, kind: input, shape index: {}]   ;;  %s3621_s2 = inlined_call_operand.vmem [shape: f32[2,1,32], index: 2, kind: input, shape index: {}]   ;;  %s3622_s3 = inlined_call_operand.vmem [shape: bf16[2,4,32,8], index: 3, kind: input, shape index: {}]   ;;  %s3623_s4 = inlined_call_operand.vmem [shape: bf16[2,4,32,8], index: 4, kind: input, shape index: {}]   ;;  %s3624_s5 = inlined_call_operand.vmem [shape: bf16[2,4,32,8], index: 5, kind: input, shape index: {}]   ;;  %s3625_s6 = inlined_call_operand.vmem [shape: bf16[2,4,8,32], index: 6, kind: input, shape index: {}]   ;;  %s3626_s7 = inlined_call_operand.vmem [shape: f32[2,1,32], index: 7, kind: input, shape index: {}]   ;;  %s3627_s8 = inlined_call_operand.vmem [shape: f32[2,1,32], index: 8, kind: input, shape index: {}]   ;;  %s3628_s9 = inlined_call_operand.vmem [shape: f32[2,1,32], index: 9, kind: input, shape index: {}]   ;;  %s3629_s10 = inlined_call_operand.vmem [shape: bf16[2,32,128], index: 10, kind: input, shape index: {}]   ;;  %s3630_s11 = inlined_call_operand.vmem [shape: f32[2,1,128], index: 11, kind: input, shape index: {}]   ;;  %s3631_s12 = inlined_call_operand.vmem [shape: bf16[2,128,32], index: 12, kind: input, shape index: {}]   ;;  %s3632_s13 = inlined_call_operand.vmem [shape: f32[2,1,32], index: 13, kind: input, shape index: {}]   ;;  %s3633_s14 = inlined_call_operand.hbm [shape: f32[16,32], index: 14, kind: output, shape index: {}]  }
   0x1   :  { %3651 = sst [smem:[#allocation21_spill]] %s3619_s0 }
   0x2   :  { %3652 = sst [smem:[#allocation22_spill]] %s3622_s3 }
   0x3   :  { %3653 = sst [smem:[#allocation23_spill]] %s3623_s4 }
   0x4   :  { %3654 = sst [smem:[#allocation24_spill]] %s3624_s5 }
   0x5   :  { %3655 = sst [smem:[#allocation25_spill]] %s3625_s6 }
   0x6   :  { %3656 = sst [smem:[#allocation26_spill]] %s3632_s13 }
   0x7   :  { %3657 = sst [smem:[#allocation27_spill]] %s3633_s14 }
   0x8   :  { %19 = vsyncpa [#allocation4], 0 }
   0x9   :  { %21 = vsyncpa [#allocation4 + $0x1], 0  ;;  %s3165_s29 = smov 0   ;;  %s3167_s30 = smov 0  }
   0xa   :  { %s3169_s15 = smov 0   ;;  %s3171_s16 = smov 0  }
   0xb   :  { %s3173_s17 = smov 0   ;;  %s3175_s18 = smov 0  }
   0xc   :  { %s3177_s19 = smov 0   ;;  %s3179_s20 = smov 0  }
   0xd LB: > { %3658 = sst [smem:[#allocation6_spill]] %s3056_s29  ;;  %s2497_s21 = sadd.s32 4294967295, %s3084_s20   ;;  %s3084_s20 = sphi %s3179_s20, %s27_s20   ;;  %s3080_s19 = sphi %s3177_s19, %s3705_s19   ;;  %s3076_s18 = sphi %s3175_s18, %s3704_s18   ;;  %s3072_s17 = sphi %s3173_s17, %s3703_s17   ;;  %s3068_s16 = sphi %s3171_s16, %s3702_s16   ;;  %s3064_s15 = sphi %s3169_s15, %s3701_s15   ;;  %s3060_s30 = sphi %s3167_s30, %s3700_s30   ;;  %s3056_s29 = sphi %s3165_s29, %s3699_s29  }
   0xe   : > { %3659 = sst [smem:[#allocation7_spill]] %s3060_s30  ;;  %s2498_s22 = sadd.s32 4294967294, %s3084_s20  }
   0xf   : > { %3660 = sst [smem:[#allocation8_spill]] %s3064_s15  ;;  %s36_s23 = sadd.s32 1, %s3076_s18 }
  0x10   : > { %3661 = sst [smem:[#allocation9_spill]] %s3068_s16  ;;  %p37_p0 = scmp.ge.s32.totalorder %s36_s23, 2 }
  0x11   : > { %3662 = sst [smem:[#allocation10_spill]] %s3072_s17  ;;  %s39_s24 = sadd.s32 1, %s3080_s19 }
  0x12   : > { %3663 = sst [smem:[#allocation11_spill]] %s3076_s18  ;;  %p420_p1 = scmp.ne.s32.totalorder %s3064_s15, %s3060_s30 }
  0x13   : > { %3664 = sst [smem:[#allocation12_spill]] %s3080_s19  ;;  %p421_p2 = scmp.eq.s32.totalorder %s2497_s21, 3 }
  0x14   : > { %3665 = sst [smem:[#allocation13_spill]] %s3084_s20  ;;  %s3707_s23 = smov (%p37_p0, %s36_s23), 0 }
  0x15   : > { %3666 = sst [smem:[#allocation14_spill]] %s3707_s23  ;;  %s3709_s24 = smov (!%p37_p0, %s39_s24), %s3080_s19 }
  0x16   : > { %p3214_p3 = por %p421_p2, %p420_p1  ;;  %p426_p4 = scmp.ne.s32.totalorder %s3060_s30, %s3056_s29 }
  0x17   : > { %p41_p5 = scmp.ge.s32.totalorder %s3709_s24, 2  ;;  %p427_p6 = scmp.eq.s32.totalorder %s2498_s22, 3 }
  0x18   : > { %s3667_s25 = scalar_select %p3214_p3, 1, 0 }
  0x19   : > { %p2501_p7 = scmp.ge.s32.totalorder %s3084_s20, 1  ;;  %p542_p8 = scmp.lt.s32.totalorder %s3084_s20, 5 }
  0x1a   : > { %3668 = sst [smem:[#allocation15_spill]] %s3667_s25  ;;  %s3711_s24 = smov (%p41_p5, %s3709_s24), 0 }
  0x1b   : > { %3669 = sst [smem:[#allocation16_spill]] %s3711_s24  ;;  %p3224_p9 = por %p427_p6, %p426_p4 }
  0x1c   : > { %p543_p10 = pnand %p2501_p7, %p542_p8  ;;  %s407_s27 = ssub.s32 %s3080_s19, %s3711_s24 }
  0x1d   : > { %s3670_s26 = scalar_select %p3224_p9, 1, 0 }
  0x1e   : > { %s410_s28 = sadd.s32 1, %s3064_s15  ;;  %p408_p11 = scmp.eq.s32.totalorder %s407_s27, 0 }
  0x1f   : > { %3671 = sst [smem:[#allocation17_spill]] %s3670_s26  ;;  %546 = sbr.rel (%p543_p10) target bundleno = 2129 (0x851), region = 76 }
  0x20   : > { %s3232_s21 = scalar_select %p408_p11, %s3064_s15, %s410_s28  }
  0x22   : > { %3672 = sst [smem:[#allocation18_spill]] %s3232_s21 }
  0x24   : > { %s3638_s22 = sand.u32 1, %s3060_s30   ;;  %p638_p12 = scmp.lt.s32.totalorder %s3072_s17, 1 }
  0x25   : > { %s3238_s23 = sshll.u32 %s3638_s22, 3  ;;  %p642_p13 = scmp.lt.s32.totalorder %s3068_s16, 1 }
  0x26   : > { %s639_s18 = scalar_select %p638_p12, %s3072_s17, 1 }
  0x27   : > { %s3243_s26 = scalar_select %p642_p13, %s3068_s16, 1 }
  0x28   : > { %s2503_s27 = sshll.u32 %s639_s18, 3  ;;  %s3673_s0 = sld [smem:[#allocation21_spill]] }
  0x29   : > { %s2588_s25 = sshll.u32 %s3243_s26, 6  ;;  %s3674_s3 = sld [smem:[#allocation22_spill]] }
  0x2a   : > { %s3675_s4 = sld [smem:[#allocation23_spill]]  ;;  %s2591_s22 = sshll.u32 %s3243_s26, 4 }
  0x2b   : > { %s3676_s5 = sld [smem:[#allocation24_spill]]  ;;  %s3302_s30 = scalar_lea.vmem %s3631_s12, %s2588_s25 }
  0x2c   : > { %s3678_s6 = sld [smem:[#allocation25_spill]] }
  0x2d   : > { %s3680_s13 = sld [smem:[#allocation26_spill]] }
  0x2e   : > { %s641_s19 = scalar_lea.vmem %s3673_s0, %s2503_s27  ;;  %s676_s27 = scalar_lea.vmem %s3628_s9, %s3243_s26 }
  0x2f   : > { %s3260_s16 = scalar_lea.vmem %s3674_s3, %s2588_s25  ;;  %s3681_s18 = sld [smem:[#allocation9_spill]] }
  0x30   : > { %s3265_s24 = scalar_lea.vmem %s3675_s4, %s2588_s25  ;;  %s637_s4 = scalar_lea.vmem [#allocation3], %s3238_s23 }
  0x31   : > { %s3270_s21 = scalar_lea.vmem %s3676_s5, %s2588_s25 }
  0x32   : > { %3677 = sst [smem:[#allocation19_spill]] %s3270_s21  ;;  %s3276_s20 = scalar_lea.vmem %s3678_s6, %s2591_s22 }
  0x33   : > { %3679 = sst [smem:[#allocation20_spill]] %s3276_s20  ;;  %s3293_s21 = scalar_lea.vmem %s3629_s10, %s2591_s22 }
  0x34   : > { %s684_s6 = scalar_lea.vmem %s3630_s11, %s3243_s26  ;;  %s692_s17 = scalar_lea.vmem %s3680_s13, %s3243_s26 }
  0x35   : > { %p2516_p0 = scmp.ne.s32.totalorder %s3681_s18, 0 }
  0x37   : > { %697 = sbr.rel (%p2516_p0) target bundleno = 62 (0x3e), region = 80 }
  0x3c   : > { %v698_v0 = vld [vmem:[%s641_s19] sm:$0xff]  ;;  %vm699_vm0 = vcmask 261120  }
  0x3d   : > { %700 = vst.msk [vmem:[#allocation2] sm:$0xff] %vm699_vm0, %v698_v0 }
  0x3e PF: > { %vm704_vm1 = vcmask 261120   ;;  %v2936_v8 = vld [vmem:[%s3260_s16 + $0x8] sm:$0xff]   ;;  %v2937_v9 = vld [vmem:[%s3260_s16 + $0x38] sm:$0xff]   ;;  %v3086_v10 = vmov 0.0   ;;  %v2938_v11 = vld [vmem:[%s3260_s16] sm:$0xff]   ;;  %vm3087_vm2 = vmmov 0   ;;  %s3682_s25 = scalar_lea.vmem %s3620_s1, %s3243_s26  ;;  %s3683_s13 = scalar_lea.vmem %s3621_s2, %s3243_s26 }
  0x3f   : > { %2666 = vmatprep.subr.bf16.mxu0 %v3086_v10  ;;  %2690 = vmatprep.subr.bf16.mxu1 %v3086_v10  ;;  %v2939_v12 = vld [vmem:[%s3260_s16 + $0x30] sm:$0xff]   ;;  %v2517_v17 = vld [vmem:[%s3682_s25] ss:$0 sm:$0xff]  ;;  %v2940_v22 = vld [vmem:[%s3260_s16 + $0x18] sm:$0xff]   ;;  %s3684_s28 = sld [smem:[#allocation19_spill]]  ;;  %vm1423_vm3 = vcmask 64512   ;;  %s3686_s29 = scalar_lea.vmem %s3626_s7, %s3243_s26 }
  0x40   : > { %2667 = vmatpush3.bf16.msra.mxu0 %v2936_v8  ;;  %2691 = vmatpush3.bf16.msra.mxu1 %v2937_v9  ;;  %v2518_v19 = vld [vmem:[%s3683_s13] ss:$0 sm:$0xff]  ;;  %v2941_v23 = vld [vmem:[%s3265_s24 + $0x18] sm:$0xff]   ;;  %v2942_v25 = vld [vmem:[%s3260_s16 + $0x10] sm:$0xff]   ;;  %vm1659_vm4 = vcmask 1043456   ;;  %s3687_s3 = scalar_lea.vmem %s3627_s8, %s3243_s26  ;;  %s3689_s25 = sld [smem:[#allocation9_spill]] }
  0x41   : > { %2668 = vmatprep.subr.bf16.mxu0 %v3086_v10  ;;  %2692 = vmatprep.subr.bf16.mxu1 %v3086_v10  ;;  %v2943_v26 = vld [vmem:[%s3265_s24 + $0x10] sm:$0xff]   ;;  %v2944_v27 = vld [vmem:[%s3260_s16 + $0x28] sm:$0xff]   ;;  %v2945_v28 = vld [vmem:[%s3265_s24 + $0x38] sm:$0xff]  }
  0x42   : > { %2670 = vmatprep.mubr.msk.bf16.mxu0 %vm3087_vm2, %v3086_v10  ;;  %2694 = vmatprep.mubr.msk.bf16.mxu1 %vm3087_vm2, %v3086_v10  ;;  %v2946_v29 = vld [vmem:[%s3260_s16 + $0x20] sm:$0xff]   ;;  %v2947_v30 = vld [vmem:[%s3265_s24 + $0x30] sm:$0xff]   ;;  %v2948_v31 = vld [vmem:[%s3265_s24 + $0x8] sm:$0xff]   ;;  %s3685_s16 = sld [smem:[#allocation20_spill]] }
  0x43   : > { %v2950_v33 = vld [vmem:[%s3265_s24] sm:$0xff]   ;;  %v2952_v35 = vld [vmem:[%s3265_s24 + $0x28] sm:$0xff]  }
  0x44   : > { %v3310_v1 = vld [vmem:[#allocation2] sm:$0xff]  ;;  %2669 = vmatpush3.bf16.msra.mxu0 %v2938_v11  ;;  %2693 = vmatpush3.bf16.msra.mxu1 %v2939_v12 }
  0x45   : > { %v705_v2 = vsel %vm704_vm1, %v3310_v1, 0.0  ;;  %2674 = vmatprep.subr.bf16.mxu0 %v3086_v10  ;;  %2706 = vmatprep.subr.bf16.mxu1 %v3086_v10  ;;  %v2949_v32 = vld [vmem:[%s3684_s28 + $0x18] sm:$0xff]   ;;  %v2951_v34 = vld [vmem:[%s3684_s28 + $0x10] sm:$0xff]   ;;  %v2954_v37 = vld [vmem:[%s3265_s24 + $0x20] sm:$0xff]  }
  0x46   : > { %706 = vadd.xlane.f32.xlu0 %v705_v2  ;;  %v2953_v36 = vld [vmem:[%s3684_s28 + $0x38] sm:$0xff]   ;;  %v2955_v38 = vld [vmem:[%s3684_s28 + $0x30] sm:$0xff]   ;;  %v2956_v39 = vld [vmem:[%s3684_s28 + $0x8] sm:$0xff]   ;;  %p2583_p1 = scmp.ne.s32.totalorder %s3689_s25, 1 }
  0x47   : > { %v2957_v40 = vld [vmem:[%s3684_s28] sm:$0xff]   ;;  %v2958_v41 = vld [vmem:[%s3684_s28 + $0x28] sm:$0xff]  }
  0x48   : > { %v2959_v42 = vld [vmem:[%s3684_s28 + $0x20] sm:$0xff]  }
  0xcf   : > { %v707_v3 = vpop.xlane.xlu0 %706 }
  0xd0   : > { %v709_v4 = vmul.f32 0.03125, %v707_v3 }
  0xd2   : > { %v710_v5 = vsub.f32 %v3310_v1, %v709_v4 }
  0xd4   : > { %v711_v6 = vmul.f32 %v710_v5, %v710_v5 }
  0xd6   : > { %v712_v7 = vsel %vm704_vm1, %v711_v6, 0.0 }
  0xd7   : > { %713 = vadd.xlane.f32.xlu0 %v712_v7 }
 0x160   : > { %v714_v13 = vpop.xlane.xlu0 %713 }
 0x161   : > { %v715_v14 = vmul.f32 0.03125, %v714_v13 }
 0x163   : > { %v716_v15 = vadd.f32 1e-05, %v715_v14 }
 0x165   : > { %2970 = vrsqrt.f32 %v716_v15 }
 0x172   : > { %v2971_v16 = vpop.eup %2970 }
 0x173   : > { %v718_v18 = vmul.f32 %v2971_v16, %v710_v5 }
 0x175   : > { %v725_v20 = vmul.f32 %v2517_v17, %v718_v18 }
 0x177   : > { %v732_v21 = vadd.f32 %v2518_v19, %v725_v20 }
 0x179   : > { %v3342_v24 = vpack.c.bf16 %v732_v21, %v732_v21 }
 0x17b   : > { %2671 = vmatmul.mubr.msk.bf16.vlgmr.msra.gmra.mxu0 %vm704_vm1, %v3342_v24  ;;  %2695 = vmatmul.mubr.msk.bf16.vlgmr.msra.gmra.mxu1 %vm704_vm1, %v3342_v24 }
 0x17c   : > { %2675 = vmatpush3.bf16.msra.mxu0 %v2940_v22  ;;  %2707 = vmatpush3.bf16.msra.mxu1 %v2941_v23 }
 0x17d   : > { %2676 = vmatprep.subr.bf16.mxu0 %v3086_v10  ;;  %2708 = vmatprep.subr.bf16.mxu1 %v3086_v10 }
 0x17e   : > { %2678 = vmatprep.mubr.msk.bf16.mxu0 %vm3087_vm2, %v3086_v10  ;;  %2710 = vmatprep.mubr.msk.bf16.mxu1 %vm3087_vm2, %v3086_v10 }
 0x180   : > { %2677 = vmatpush3.bf16.msra.mxu0 %v2942_v25  ;;  %2709 = vmatpush3.bf16.msra.mxu1 %v2943_v26 }
 0x181   : > { %2682 = vmatprep.subr.bf16.mxu0 %v3086_v10  ;;  %2722 = vmatprep.subr.bf16.mxu1 %v3086_v10 }
 0x183   : > { %2679 = vmatmul.mubr.msk.bf16.vlgmr.msra.gmra.mxu0 %vm704_vm1, %v3342_v24  ;;  %2711 = vmatmul.mubr.msk.bf16.vlgmr.msra.gmra.mxu1 %vm704_vm1, %v3342_v24 }
 0x184   : > { %2683 = vmatpush3.bf16.msra.mxu0 %v2944_v27  ;;  %2723 = vmatpush3.bf16.msra.mxu1 %v2945_v28 }
 0x185   : > { %2684 = vmatprep.subr.bf16.mxu0 %v3086_v10  ;;  %2724 = vmatprep.subr.bf16.mxu1 %v3086_v10 }
 0x186   : > { %2686 = vmatprep.mubr.msk.bf16.mxu0 %vm3087_vm2, %v3086_v10  ;;  %2726 = vmatprep.mubr.msk.bf16.mxu1 %vm3087_vm2, %v3086_v10 }
 0x188   : > { %2685 = vmatpush3.bf16.msra.mxu0 %v2946_v29  ;;  %2725 = vmatpush3.bf16.msra.mxu1 %v2947_v30 }
 0x189   : > { %2698 = vmatprep.subr.bf16.mxu0 %v3086_v10  ;;  %2738 = vmatprep.subr.bf16.mxu1 %v3086_v10 }
 0x18b   : > { %2687 = vmatmul.mubr.msk.bf16.vlgmr.msra.gmra.mxu0 %vm704_vm1, %v3342_v24  ;;  %2727 = vmatmul.mubr.msk.bf16.vlgmr.msra.gmra.mxu1 %vm704_vm1, %v3342_v24 }
 0x18c   : > { %2699 = vmatpush3.bf16.msra.mxu0 %v2948_v31  ;;  %2739 = vmatpush3.bf16.msra.mxu1 %v2949_v32 }
 0x18d   : > { %2700 = vmatprep.subr.bf16.mxu0 %v3086_v10  ;;  %2740 = vmatprep.subr.bf16.mxu1 %v3086_v10 }
 0x18e   : > { %2702 = vmatprep.mubr.msk.bf16.mxu0 %vm3087_vm2, %v3086_v10  ;;  %2742 = vmatprep.mubr.msk.bf16.mxu1 %vm3087_vm2, %v3086_v10 }
 0x190   : > { %2701 = vmatpush3.bf16.msra.mxu0 %v2950_v33  ;;  %2741 = vmatpush3.bf16.msra.mxu1 %v2951_v34 }
 0x191   : > { %2714 = vmatprep.subr.bf16.mxu0 %v3086_v10  ;;  %2754 = vmatprep.subr.bf16.mxu1 %v3086_v10 }
 0x193   : > { %2703 = vmatmul.mubr.msk.bf16.vlgmr.msra.gmra.mxu0 %vm704_vm1, %v3342_v24  ;;  %2743 = vmatmul.mubr.msk.bf16.vlgmr.msra.gmra.mxu1 %vm704_vm1, %v3342_v24 }
 0x194   : > { %2715 = vmatpush3.bf16.msra.mxu0 %v2952_v35  ;;  %2755 = vmatpush3.bf16.msra.mxu1 %v2953_v36 }
 0x195   : > { %2716 = vmatprep.subr.bf16.mxu0 %v3086_v10  ;;  %2756 = vmatprep.subr.bf16.mxu1 %v3086_v10 }
 0x196   : > { %2718 = vmatprep.mubr.msk.bf16.mxu0 %vm3087_vm2, %v3086_v10  ;;  %2758 = vmatprep.mubr.msk.bf16.mxu1 %vm3087_vm2, %v3086_v10 }
 0x198   : > { %2717 = vmatpush3.bf16.msra.mxu0 %v2954_v37  ;;  %2757 = vmatpush3.bf16.msra.mxu1 %v2955_v38 }
 0x199   : > { %2730 = vmatprep.subr.bf16.mxu0 %v3086_v10  ;;  %2768 = vmatprep.subr.bf16.mxu1 %v3086_v10 }
 0x19b   : > { %2719 = vmatmul.mubr.msk.bf16.vlgmr.msra.gmra.mxu0 %vm704_vm1, %v3342_v24  ;;  %2759 = vmatmul.mubr.msk.bf16.vlgmr.msra.gmra.mxu1 %vm704_vm1, %v3342_v24 }
 0x19c   : > { %2731 = vmatpush3.bf16.msra.mxu0 %v2956_v39  ;;  %2734 = vmatprep.mubr.msk.bf16.mxu0 %vm3087_vm2, %v3086_v10 }
 0x19d   : > { %2732 = vmatprep.subr.bf16.mxu0 %v3086_v10  ;;  %2770 = vmatprep.mubr.msk.bf16.mxu1 %vm3087_vm2, %v3086_v10 }
 0x1a0   : > { %2733 = vmatpush3.bf16.msra.mxu0 %v2957_v40 }
 0x1a1   : > { %2746 = vmatprep.subr.bf16.mxu0 %v3086_v10 }
 0x1a3   : > { %2735 = vmatmul.mubr.msk.bf16.vlgmr.msra.gmra.mxu0 %vm704_vm1, %v3342_v24 }
 0x1a4   : > { %2747 = vmatpush3.bf16.msra.mxu0 %v2958_v41  ;;  %2750 = vmatprep.mubr.msk.bf16.mxu0 %vm3087_vm2, %v3086_v10 }
 0x1a5   : > { %2748 = vmatprep.subr.bf16.mxu0 %v3086_v10 }
 0x1a8   : > { %2749 = vmatpush3.bf16.msra.mxu0 %v2959_v42 }
 0x1a9   : > { %2762 = vmatprep.subr.bf16.mxu0 %v3086_v10 }
 0x1ab   : > { %2751 = vmatmul.mubr.msk.bf16.vlgmr.msra.gmra.mxu0 %vm704_vm1, %v3342_v24 }
 0x1ac   : > { %2764 = vmatprep.mubr.msk.bf16.mxu0 %vm3087_vm2, %v3086_v10 }
 0x23b   : > { %v3430_v43 = vpop.f32.mrf.mxu0  ;;  %v955_v44 = vpop.f32.mrf.mxu1 }
 0x23c   : > { %v1418_v12 = vpack.c.bf16 %v955_v44, %v955_v44  ;;  %v1415_v25 = vpack.c.bf16 %v3430_v43, %v3430_v43 }
 0x23d   : > { %v2672_v45 = vpop.f32.mrf.mxu0  ;;  %v2696_v46 = vpop.f32.mrf.mxu1 }
 0x23f   : > { %v802_v47 = vpop.f32.mrf.mxu0  ;;  %v958_v48 = vpop.f32.mrf.mxu1 }
 0x240   : > { %v1409_v48 = vlaneseq }
 0x241   : > { %v2673_v49 = vpop.f32.mrf.mxu0  ;;  %v2697_v50 = vpop.f32.mrf.mxu1 }
 0x243   : > { %v851_v51 = vpop.f32.mrf.mxu0  ;;  %v1075_v52 = vpop.f32.mrf.mxu1 }
 0x244   : > { %v1420_v53 = vpack.c.bf16 %v1075_v52, %v1075_v52  ;;  %v1416_v63 = vpack.c.bf16 %v851_v51, %v851_v51  ;;  %v1410_v51 = vshrl.u32 %v1409_v48, 7  ;;  %v1412_v52 = vand.u32 127, %v1409_v48 }
 0x245   : > { %v2680_v54 = vpop.f32.mrf.mxu0  ;;  %v2712_v55 = vpop.f32.mrf.mxu1 }
 0x246   : > { %v1474_v56 = vsel %vm1423_vm3, %v1420_v53, 0  ;;  %vm1413_vm5 = vcmp.le.s32.totalorder %v1412_v52, %v1410_v51 }
 0x247   : > { %v854_v57 = vpop.f32.mrf.mxu0  ;;  %v1078_v58 = vpop.f32.mrf.mxu1  ;;  %2769 = vmatpush3.bf16.xpose.msra.mxu1 %v1474_v56  ;;  %v3088_v56 = vmov -1e+30  }
 0x248   : > { %2780 = vmatprep.subr.bf16.mxu1 %v3086_v10  ;;  %v1414_v57 = vsel %vm1413_vm5, 0.0, %v3088_v56 }
 0x249   : > { %v2681_v59 = vpop.f32.mrf.mxu0  ;;  %v2713_v60 = vpop.f32.mrf.mxu1 }
 0x24b   : > { %v903_v61 = vpop.f32.mrf.mxu0  ;;  %v1179_v62 = vpop.f32.mrf.mxu1 }
 0x24c   : > { %v1422_v0 = vpack.c.bf16 %v1179_v62, %v1179_v62  ;;  %v1417_v35 = vpack.c.bf16 %v903_v61, %v903_v61 }
 0x24d   : > { %v2688_v2 = vpop.f32.mrf.mxu0  ;;  %v2728_v3 = vpop.f32.mrf.mxu1 }
 0x24e   : > { %v1566_v4 = vsel %vm1423_vm3, %v1422_v0, 0  ;;  %2771 = vmatmul.mubr.msk.bf16.vlgmr.msra.gmra.mxu1 %vm1423_vm3, %v1416_v63 }
 0x24f   : > { %v906_v5 = vpop.f32.mrf.mxu0  ;;  %v1182_v6 = vpop.f32.mrf.mxu1  ;;  %2781 = vmatpush3.bf16.xpose.msra.mxu1 %v1566_v4  ;;  %2782 = vmatprep.mubr.msk.bf16.mxu1 %vm3087_vm2, %v3086_v10 }
 0x250   : > { %2792 = vmatprep.subr.bf16.mxu1 %v3086_v10 }
 0x251   : > { %v2689_v7 = vpop.f32.mrf.mxu0  ;;  %v2729_v8 = vpop.f32.mrf.mxu1 }
 0x253   : > { %v1023_v9 = vpop.f32.mrf.mxu0  ;;  %v1299_v11 = vpop.f32.mrf.mxu1 }
 0x254   : > { %v1419_v13 = vpack.c.bf16 %v1023_v9, %v1023_v9  ;;  %v1653_v14 = vpack.c.bf16 %v1299_v11, %v1299_v11 }
 0x255   : > { %v2704_v15 = vpop.f32.mrf.mxu0  ;;  %v2744_v16 = vpop.f32.mrf.mxu1 }
 0x256   : > { %v1428_v17 = vsel %vm1423_vm3, %v1419_v13, 0  ;;  %v1707_v18 = vsel %vm1659_vm4, %v1653_v14, 0  ;;  %2783 = vmatmul.mubr.msk.bf16.vlgmr.msra.gmra.mxu1 %vm1423_vm3, %v1418_v12 }
 0x257   : > { %v1026_v19 = vpop.f32.mrf.mxu0  ;;  %v1302_v20 = vpop.f32.mrf.mxu1  ;;  %2763 = vmatpush3.bf16.xpose.msra.mxu0 %v1428_v17  ;;  %2793 = vmatpush3.bf16.msra.mxu1 %v1707_v18 }
 0x258   : > { %2774 = vmatprep.subr.bf16.mxu0 %v3086_v10  ;;  %2794 = vmatprep.mubr.msk.bf16.mxu1 %vm3087_vm2, %v3086_v10 }
 0x259   : > { %v2705_v21 = vpop.f32.mrf.mxu0  ;;  %v2745_v22 = vpop.f32.mrf.mxu1  ;;  %2804 = vmatprep.subr.bf16.mxu1 %v3086_v10 }
 0x25b   : > { %v1127_v23 = vpop.f32.mrf.mxu0  ;;  %v3446_v24 = vpop.f32.mrf.mxu1 }
 0x25c   : > { %v1421_v26 = vpack.c.bf16 %v1127_v23, %v1127_v23 }
 0x25d   : > { %v2720_v27 = vpop.f32.mrf.mxu0  ;;  %v2760_v28 = vpop.f32.mrf.mxu1 }
 0x25e   : > { %v1520_v29 = vsel %vm1423_vm3, %v1421_v26, 0  ;;  %2765 = vmatmul.mubr.msk.bf16.vlgmr.msra.gmra.mxu0 %vm1423_vm3, %v1415_v25 }
 0x25f   : > { %v1130_v30 = vpop.f32.mrf.mxu0  ;;  %v1406_v31 = vpop.f32.mrf.mxu1  ;;  %2775 = vmatpush3.bf16.xpose.msra.mxu0 %v1520_v29  ;;  %2776 = vmatprep.mubr.msk.bf16.mxu0 %vm3087_vm2, %v3086_v10  ;;  %v1655_v29 = vpack.c.bf16 %v3446_v24, %v3446_v24 }
 0x260   : > { %2786 = vmatprep.subr.bf16.mxu0 %v3086_v10 }
 0x261   : > { %v2721_v32 = vpop.f32.mrf.mxu0  ;;  %v2761_v33 = vpop.f32.mrf.mxu1 }
 0x263   : > { %v1247_v34 = vpop.f32.mrf.mxu0 }
 0x264   : > { %v1652_v36 = vpack.c.bf16 %v1247_v34, %v1247_v34  ;;  %v1799_v34 = vsel %vm1659_vm4, %v1655_v29, 0 }
 0x265   : > { %v2736_v37 = vpop.f32.mrf.mxu0 }
 0x266   : > { %v1661_v38 = vsel %vm1659_vm4, %v1652_v36, 0  ;;  %2777 = vmatmul.mubr.msk.bf16.vlgmr.msra.gmra.mxu0 %vm1423_vm3, %v1417_v35 }
 0x267   : > { %v1250_v39 = vpop.f32.mrf.mxu0  ;;  %2787 = vmatpush3.bf16.msra.mxu0 %v1661_v38  ;;  %2788 = vmatprep.mubr.msk.bf16.mxu0 %vm3087_vm2, %v3086_v10 }
 0x268   : > { %2798 = vmatprep.subr.bf16.mxu0 %v3086_v10 }
 0x269   : > { %v2737_v40 = vpop.f32.mrf.mxu0 }
 0x26a   : > { %v1849_v40 = vld [vmem:[%s3685_s16] sm:$0xf] }
 0x26b   : > { %v1351_v41 = vpop.f32.mrf.mxu0 }
 0x26c   : > { %v1654_v25 = vpack.c.bf16 %v1351_v41, %v1351_v41  ;;  %v1857_v41 = vsel %vm1659_vm4, %v1849_v40, 0 }
 0x26d   : > { %v2752_v42 = vpop.f32.mrf.mxu0 }
 0x26e   : > { %v1753_v30 = vsel %vm1659_vm4, %v1654_v25, 0  ;;  %v1850_v42 = vld [vmem:[%s3685_s16 + $0x4] sm:$0xf] }
 0x26f   : > { %v1354_v43 = vpop.f32.mrf.mxu0 }
 0x270   : > { %v1903_v43 = vsel %vm1659_vm4, %v1850_v42, 0 }
 0x271   : > { %v2753_v44 = vpop.f32.mrf.mxu0 }
 0x30e   : > { %v1510_v45 = vpop.f32.mrf.mxu1 }
 0x30f   : > { %v1511_v61 = vadd.f32 %v1510_v45, %v1414_v57 }
 0x310   : > { %v2772_v46 = vpop.f32.mrf.mxu1 }
 0x311   : > { %v1611_v3 = vsel %vm1423_vm3, %v1511_v61, -inf }
 0x312   : > { %v1513_v47 = vpop.f32.mrf.mxu1 }
 0x314   : > { %v2773_v49 = vpop.f32.mrf.mxu1 }
 0x316   : > { %v1602_v50 = vpop.f32.mrf.mxu1 }
 0x317   : > { %v1603_v2 = vadd.f32 %v1602_v50, %v1414_v57  ;;  %v1851_v50 = vld [vmem:[%s3685_s16 + $0x8] sm:$0xf] }
 0x318   : > { %v2784_v53 = vpop.f32.mrf.mxu1 }
 0x319   : > { %v1617_v7 = vsel %vm1423_vm3, %v1603_v2, -inf }
 0x31a   : > { %v1605_v54 = vpop.f32.mrf.mxu1 }
 0x31b   : > { %v1949_v54 = vsel %vm1659_vm4, %v1851_v50, 0  ;;  %v2960_v50 = vld [vmem:[%s3293_s21 + $0x8] sm:$0xff]  }
 0x31c   : > { %v2785_v55 = vpop.f32.mrf.mxu1 }
 0x31e   : > { %v1464_v58 = vpop.f32.mrf.mxu0 }
 0x31f   : > { %v1465_v59 = vadd.f32 %v1464_v58, %v1414_v57  ;;  %v1852_v58 = vld [vmem:[%s3685_s16 + $0xc] sm:$0xf] }
 0x320   : > { %v2766_v60 = vpop.f32.mrf.mxu0 }
 0x321   : > { %v1608_v62 = vsel %vm1423_vm3, %v1465_v59, -inf }
 0x322   : > { %1609 = vmax.xlane.f32.xlu1 %v1608_v62  ;;  %v1467_v63 = vpop.f32.mrf.mxu0 }
 0x323   : > { %v1995_v63 = vsel %vm1659_vm4, %v1852_v58, 0 }
 0x324   : > { %v2767_v0 = vpop.f32.mrf.mxu0 }
 0x326   : > { %1612 = vmax.xlane.f32.xlu1 %v1611_v3  ;;  %v1556_v4 = vpop.f32.mrf.mxu0 }
 0x327   : > { %v1557_v5 = vadd.f32 %v1556_v4, %v1414_v57 }
 0x328   : > { %v2778_v6 = vpop.f32.mrf.mxu0 }
 0x329   : > { %v1614_v8 = vsel %vm1423_vm3, %v1557_v5, -inf }
 0x32a   : > { %1618 = vmax.xlane.f32.xlu1 %v1617_v7  ;;  %1615 = vmax.xlane.f32.xlu0 %v1614_v8  ;;  %v1559_v9 = vpop.f32.mrf.mxu0 }
 0x32c   : > { %v2779_v11 = vpop.f32.mrf.mxu0 }
 0x3ab   : > { %v1610_v12 = vpop.xlane.xlu1 %1609 }
 0x3ac   : > { %v1620_v13 = vsub.f32 %v1465_v59, %v1610_v12 }
 0x3ae   : > { %v1624_v14 = vmul.f32 1.442695, %v1620_v13 }
 0x3af   : > { %v1613_v15 = vpop.xlane.xlu1 %1612 }
 0x3b0   : > { %2972 = vpow2.f32 %v1624_v14  ;;  %v1621_v16 = vsub.f32 %v1511_v61, %v1613_v15 }
 0x3b2   : > { %v1626_v17 = vmul.f32 1.442695, %v1621_v16 }
 0x3b3   : > { %v1619_v18 = vpop.xlane.xlu1 %1618  ;;  %v1616_v19 = vpop.xlane.xlu0 %1615 }
 0x3b4   : > { %2974 = vpow2.f32 %v1626_v17  ;;  %v1623_v20 = vsub.f32 %v1603_v2, %v1619_v18  ;;  %v1622_v21 = vsub.f32 %v1557_v5, %v1616_v19 }
 0x3b6   : > { %v1630_v22 = vmul.f32 1.442695, %v1623_v20  ;;  %v1628_v23 = vmul.f32 1.442695, %v1622_v21 }
 0x3b8   : > { %2976 = vpow2.f32 %v1630_v22 }
 0x3b9   : > { %2978 = vpow2.f32 %v1628_v23 }
 0x3bd   : > { %v2973_v26 = vpop.eup %2972 }
 0x3be   : > { %v1632_v27 = vsel %vm1423_vm3, %v2973_v26, 0.0  ;;  %v1648_v28 = vpack.c.bf16 %v2973_v26, %v2973_v26 }
 0x3bf   : > { %1633 = vadd.xlane.f32.xlu0 %v1632_v27 }
 0x3c0   : > { %2789 = vmatmul.mubr.msk.bf16.vlgmr.msra.gmra.mxu0 %vm1423_vm3, %v1648_v28 }
 0x3c1   : > { %v2975_v31 = vpop.eup %2974  ;;  %2799 = vmatpush3.bf16.msra.mxu0 %v1753_v30  ;;  %2800 = vmatprep.mubr.msk.bf16.mxu0 %vm3087_vm2, %v3086_v10 }
 0x3c2   : > { %v1635_v32 = vsel %vm1423_vm3, %v2975_v31, 0.0  ;;  %v1649_v33 = vpack.c.bf16 %v2975_v31, %v2975_v31  ;;  %2810 = vmatprep.subr.bf16.mxu0 %v3086_v10 }
 0x3c3   : > { %1636 = vadd.xlane.f32.xlu1 %v1635_v32 }
 0x3c4   : > { %2795 = vmatmul.mubr.msk.bf16.vlgmr.msra.gmra.mxu1 %vm1423_vm3, %v1649_v33 }
 0x3c5   : > { %v2977_v24 = vpop.eup %2976  ;;  %2805 = vmatpush3.bf16.msra.mxu1 %v1799_v34  ;;  %2806 = vmatprep.mubr.msk.bf16.mxu1 %vm3087_vm2, %v3086_v10 }
 0x3c6   : > { %v2979_v35 = vpop.eup %2978  ;;  %v1641_v36 = vsel %vm1423_vm3, %v2977_v24, 0.0  ;;  %2816 = vmatprep.subr.bf16.mxu1 %v3086_v10  ;;  %v1651_v39 = vpack.c.bf16 %v2977_v24, %v2977_v24 }
 0x3c7   : > { %1642 = vadd.xlane.f32.xlu1 %v1641_v36  ;;  %v1638_v37 = vsel %vm1423_vm3, %v2979_v35, 0.0  ;;  %v1650_v38 = vpack.c.bf16 %v2979_v35, %v2979_v35 }
 0x3c8   : > { %1639 = vadd.xlane.f32.xlu0 %v1638_v37 }
 0x3c9   : > { %2801 = vmatmul.mubr.msk.bf16.vlgmr.msra.gmra.mxu0 %vm1423_vm3, %v1650_v38 }
 0x3ca   : > { %2812 = vmatprep.mubr.msk.bf16.mxu0 %vm3087_vm2, %v3086_v10  ;;  %2811 = vmatpush3.bf16.msra.mxu0 %v1857_v41 }
 0x3cb   : > { %2822 = vmatprep.subr.bf16.mxu0 %v3086_v10 }
 0x3cc   : > { %2807 = vmatmul.mubr.msk.bf16.vlgmr.msra.gmra.mxu1 %vm1423_vm3, %v1651_v39  ;;  %v2567_v39 = vld [vmem:[%s3686_s29] ss:$0 sm:$0xff] }
 0x3cd   : > { %2818 = vmatprep.mubr.msk.bf16.mxu1 %vm3087_vm2, %v3086_v10  ;;  %2817 = vmatpush3.bf16.msra.mxu1 %v1903_v43 }
 0x3ce   : > { %2828 = vmatprep.subr.bf16.mxu1 %v3086_v10 }
 0x448   : > { %v1634_v44 = vpop.xlane.xlu0 %1633 }
 0x449   : > { %2980 = vrcp.f32 %v1634_v44 }
 0x44c   : > { %v1637_v45 = vpop.xlane.xlu1 %1636 }
 0x44d   : > { %2982 = vrcp.f32 %v1637_v45 }
 0x450   : > { %v1643_v47 = vpop.xlane.xlu1 %1642 }
 0x451   : > { %v1640_v46 = vpop.xlane.xlu0 %1639 }
 0x452   : > { %2984 = vrcp.f32 %v1640_v46 }
 0x453   : > { %2986 = vrcp.f32 %v1643_v47 }
 0x456   : > { %v2981_v48 = vpop.eup %2980 }
 0x45a   : > { %v2983_v55 = vpop.eup %2982 }
 0x45f   : > { %v2985_v2 = vpop.eup %2984 }
 0x460   : > { %v2987_v7 = vpop.eup %2986 }
 0x480   : > { %v1697_v49 = vpop.f32.mrf.mxu0 }
 0x481   : > { %v1841_v51 = vmul.f32 %v2981_v48, %v1697_v49 }
 0x482   : > { %v2790_v52 = vpop.f32.mrf.mxu0 }
 0x483   : > { %v1845_v53 = vpack.c.bf16 %v1841_v51, %v1841_v51 }
 0x484   : > { %v1700_v56 = vpop.f32.mrf.mxu0  ;;  %v1743_v57 = vpop.f32.mrf.mxu1 }
 0x485   : > { %v1842_v59 = vmul.f32 %v2983_v55, %v1743_v57  ;;  %2813 = vmatmul.mubr.msk.bf16.vlgmr.msra.gmra.mxu0 %vm1423_vm3, %v1845_v53  ;;  %v2568_v55 = vld [vmem:[%s3687_s3] ss:$0 sm:$0xff] }
 0x486   : > { %v2791_v60 = vpop.f32.mrf.mxu0  ;;  %v2796_v61 = vpop.f32.mrf.mxu1  ;;  %2823 = vmatpush3.bf16.msra.mxu0 %v1949_v54  ;;  %2824 = vmatprep.mubr.msk.bf16.mxu0 %vm3087_vm2, %v3086_v10  ;;  %v2569_v57 = vld [vmem:[%s676_s27] ss:$0 sm:$0xff] }
 0x487   : > { %v1846_v62 = vpack.c.bf16 %v1842_v59, %v1842_v59  ;;  %2834 = vmatprep.subr.bf16.mxu0 %v3086_v10  ;;  %v2962_v61 = vld [vmem:[%s3302_s30 + $0x38] sm:$0xff]  }
 0x488   : > { %v1746_v0 = vpop.f32.mrf.mxu1 }
 0x489   : > { %v1789_v3 = vpop.f32.mrf.mxu0  ;;  %2819 = vmatmul.mubr.msk.bf16.vlgmr.msra.gmra.mxu1 %vm1423_vm3, %v1846_v62  ;;  %v2963_v62 = vld [vmem:[%s3302_s30 + $0x30] sm:$0xff]   ;;  %v2965_v0 = vld [vmem:[%s3302_s30 + $0x20] sm:$0xff]  }
 0x48a   : > { %v1843_v4 = vmul.f32 %v2985_v2, %v1789_v3  ;;  %v2797_v5 = vpop.f32.mrf.mxu1  ;;  %2829 = vmatpush3.bf16.msra.mxu1 %v1995_v63  ;;  %2830 = vmatprep.mubr.msk.bf16.mxu1 %vm3087_vm2, %v3086_v10  ;;  %v2964_v63 = vld [vmem:[%s3302_s30 + $0x28] sm:$0xff]   ;;  %v2966_v2 = vld [vmem:[%s3302_s30 + $0x18] sm:$0xff]   ;;  %v2967_v3 = vld [vmem:[%s3302_s30 + $0x10] sm:$0xff]  }
 0x48b   : > { %v2802_v6 = vpop.f32.mrf.mxu0  ;;  %2842 = vmatprep.subr.bf16.mxu1 %v3086_v10  ;;  %v2969_v5 = vld [vmem:[%s3302_s30] sm:$0xff]  }
 0x48c   : > { %v1847_v8 = vpack.c.bf16 %v1843_v4, %v1843_v4  ;;  %v1835_v9 = vpop.f32.mrf.mxu1  ;;  %v2968_v4 = vld [vmem:[%s3302_s30 + $0x8] sm:$0xff]   ;;  %v2570_v6 = vld [vmem:[%s684_s6] ss:$0 sm:$0xff] }
 0x48d   : > { %v1792_v11 = vpop.f32.mrf.mxu0  ;;  %v1844_v12 = vmul.f32 %v2987_v7, %v1835_v9 }
 0x48e   : > { %2825 = vmatmul.mubr.msk.bf16.vlgmr.msra.gmra.mxu0 %vm1423_vm3, %v1847_v8  ;;  %v2808_v13 = vpop.f32.mrf.mxu1 }
 0x48f   : > { %v1848_v14 = vpack.c.bf16 %v1844_v12, %v1844_v12  ;;  %v2803_v15 = vpop.f32.mrf.mxu0  ;;  %2838 = vmatprep.mubr.msk.bf16.mxu0 %vm3087_vm2, %v3086_v10  ;;  %2835 = vmatpush3.bf16.msra.mxu0 %v2960_v50 }
 0x490   : > { %v1838_v16 = vpop.f32.mrf.mxu1  ;;  %2836 = vmatprep.subr.bf16.mxu0 %v3086_v10 }
 0x491   : > { %2831 = vmatmul.mubr.msk.bf16.vlgmr.msra.gmra.mxu1 %vm1423_vm3, %v1848_v14 }
 0x492   : > { %v2809_v17 = vpop.f32.mrf.mxu1  ;;  %2858 = vmatprep.mubr.msk.bf16.mxu1 %vm3087_vm2, %v3086_v10  ;;  %2843 = vmatpush3.bf16.msra.mxu1 %v2962_v61 }
 0x493   : > { %2844 = vmatprep.subr.bf16.mxu1 %v3086_v10 }
 0x496   : > { %2845 = vmatpush3.bf16.msra.mxu1 %v2963_v62 }
 0x497   : > { %2846 = vmatprep.subr.bf16.mxu1 %v3086_v10 }
 0x49a   : > { %2847 = vmatpush3.bf16.msra.mxu1 %v2964_v63 }
 0x49b   : > { %2848 = vmatprep.subr.bf16.mxu1 %v3086_v10 }
 0x49e   : > { %2849 = vmatpush3.bf16.msra.mxu1 %v2965_v0 }
 0x49f   : > { %2850 = vmatprep.subr.bf16.mxu1 %v3086_v10 }
 0x4a2   : > { %2851 = vmatpush3.bf16.msra.mxu1 %v2966_v2 }
 0x4a3   : > { %2852 = vmatprep.subr.bf16.mxu1 %v3086_v10 }
 0x4a6   : > { %2853 = vmatpush3.bf16.msra.mxu1 %v2967_v3 }
 0x4a7   : > { %2854 = vmatprep.subr.bf16.mxu1 %v3086_v10 }
 0x4aa   : > { %2855 = vmatpush3.bf16.msra.mxu1 %v2968_v4 }
 0x4ab   : > { %2856 = vmatprep.subr.bf16.mxu1 %v3086_v10 }
 0x4ae   : > { %2857 = vmatpush3.bf16.msra.mxu1 %v2969_v5 }
 0x545   : > { %v1893_v18 = vpop.f32.mrf.mxu0 }
 0x546   : > { %v2037_v27 = vsel %vm704_vm1, %v1893_v18, 0.0 }
 0x547   : > { %v2814_v19 = vpop.f32.mrf.mxu0 }
 0x549   : > { %v1896_v20 = vpop.f32.mrf.mxu0  ;;  %v1939_v21 = vpop.f32.mrf.mxu1 }
 0x54a   : > { %v2038_v25 = vsel %vm704_vm1, %v1939_v21, 0.0 }
 0x54b   : > { %v2815_v22 = vpop.f32.mrf.mxu0  ;;  %v2820_v23 = vpop.f32.mrf.mxu1  ;;  %v2039_v29 = vadd.f32 %v2038_v25, %v2037_v27 }
 0x54c   : > { %v2582_v23 = vld [vmem:[%s692_s17] ss:$0 sm:$0xff] }
 0x54d   : > { %v1942_v26 = vpop.f32.mrf.mxu1 }
 0x54e   : > { %v1985_v28 = vpop.f32.mrf.mxu0 }
 0x54f   : > { %v2040_v30 = vsel %vm704_vm1, %v1985_v28, 0.0  ;;  %v2821_v31 = vpop.f32.mrf.mxu1 }
 0x550   : > { %v2826_v32 = vpop.f32.mrf.mxu0  ;;  %v2041_v33 = vadd.f32 %v2040_v30, %v2039_v29 }
 0x551   : > { %v2031_v34 = vpop.f32.mrf.mxu1 }
 0x552   : > { %v1988_v24 = vpop.f32.mrf.mxu0  ;;  %v2042_v35 = vsel %vm704_vm1, %v2031_v34, 0.0 }
 0x553   : > { %v2043_v36 = vadd.f32 %v2042_v35, %v2041_v33  ;;  %v2832_v37 = vpop.f32.mrf.mxu1 }
 0x554   : > { %v2827_v38 = vpop.f32.mrf.mxu0 }
 0x555   : > { %v2044_v40 = vadd.f32 %v2043_v36, %v3310_v1  ;;  %v2034_v41 = vpop.f32.mrf.mxu1  ;;  %v2961_v1 = vld [vmem:[%s3293_s21] sm:$0xff]  }
 0x556   : > { %2837 = vmatpush3.bf16.msra.mxu0 %v2961_v1 }
 0x557   : > { %v2833_v42 = vpop.f32.mrf.mxu1  ;;  %v3520_v43 = vadd.f32 %v2567_v39, %v2044_v40 }
 0x559   : > { %v2055_v44 = vsel %vm704_vm1, %v3520_v43, 0.0 }
 0x55a   : > { %2056 = vadd.xlane.f32.xlu0 %v2055_v44 }
 0x5e3   : > { %v2057_v45 = vpop.xlane.xlu0 %2056 }
 0x5e4   : > { %v2058_v46 = vmul.f32 0.03125, %v2057_v45 }
 0x5e6   : > { %v2059_v47 = vsub.f32 %v3520_v43, %v2058_v46 }
 0x5e8   : > { %v2060_v48 = vmul.f32 %v2059_v47, %v2059_v47 }
 0x5ea   : > { %v2061_v49 = vsel %vm704_vm1, %v2060_v48, 0.0 }
 0x5eb   : > { %2062 = vadd.xlane.f32.xlu1 %v2061_v49 }
 0x674   : > { %v2063_v51 = vpop.xlane.xlu1 %2062 }
 0x675   : > { %v2064_v52 = vmul.f32 0.03125, %v2063_v51 }
 0x677   : > { %v2065_v53 = vadd.f32 1e-05, %v2064_v52 }
 0x679   : > { %2988 = vrsqrt.f32 %v2065_v53 }
 0x686   : > { %v2989_v54 = vpop.eup %2988 }
 0x687   : > { %v2067_v56 = vmul.f32 %v2989_v54, %v2059_v47 }
 0x689   : > { %v2074_v58 = vmul.f32 %v2568_v55, %v2067_v56 }
 0x68b   : > { %v2081_v59 = vadd.f32 %v2569_v57, %v2074_v58 }
 0x68d   : > { %v2082_v60 = vpack.c.bf16 %v2081_v59, %v2081_v59 }
 0x68f   : > { %2839 = vmatmul.mubr.msk.bf16.vlgmr.msra.gmra.mxu0 %vm704_vm1, %v2082_v60 }
 0x74f   : > { %v2143_v7 = vpop.f32.mrf.mxu0 }
 0x750   : > { %v2144_v8 = vadd.f32 %v2570_v6, %v2143_v7 }
 0x751   : > { %v2840_v9 = vpop.f32.mrf.mxu0 }
 0x752   : > { %v2150_v11 = vmul.f32 %v2144_v8, %v2144_v8  ;;  %v2149_v10 = vmul.f32 0.5, %v2144_v8 }
 0x753   : > { %v2146_v12 = vpop.f32.mrf.mxu0 }
 0x754   : > { %v2151_v13 = vmul.f32 %v2150_v11, %v2144_v8 }
 0x755   : > { %v2841_v14 = vpop.f32.mrf.mxu0 }
 0x756   : > { %v2152_v15 = vmul.f32 0.044715, %v2151_v13 }
 0x758   : > { %v2153_v16 = vadd.f32 %v2152_v15, %v2144_v8 }
 0x75a   : > { %v2154_v17 = vmul.f32 0.7978846, %v2153_v16 }
 0x75c   : > { %2990 = vtanh.f32 %v2154_v17 }
 0x769   : > { %v2991_v18 = vpop.eup %2990 }
 0x76a   : > { %v2156_v19 = vadd.f32 1.0, %v2991_v18 }
 0x76c   : > { %v2157_v20 = vmul.f32 %v2156_v19, %v2149_v10 }
 0x76e   : > { %v2158_v21 = vpack.c.bf16 %v2157_v20, %v2157_v20 }
 0x770   : > { %2859 = vmatmul.mubr.bf16.vlgmr.msra.gmra.mxu1 %v2158_v21 }
 0x830   : > { %v2257_v22 = vpop.f32.mrf.mxu1 }
 0x831   : > { %v2263_v25 = vadd.f32 %v2257_v22, %v3520_v43 }
 0x832   : > { %v2860_v26 = vpop.f32.mrf.mxu1  ;;  %2276 = sbr.rel (%p2583_p1) target bundleno = 2104 (0x838), region = 84 }
 0x833   : > { %v2271_v27 = vadd.f32 %v2582_v23, %v2263_v25 }
 0x834   : > { %v2260_v28 = vpop.f32.mrf.mxu1 }
 0x835   : > { %2272 = vst.msk [vmem:[#allocation2] sm:$0xff] %vm704_vm1, %v2271_v27 }
 0x836   : > { %v2861_v29 = vpop.f32.mrf.mxu1 }
 0x837   : > { %2277 = vst.msk [vmem:[%s637_s4] sm:$0xff] %vm704_vm1, %v2271_v27 }
 0x838 PF: > { %s3690_s22 = sld [smem:[#allocation10_spill]]  ;;  %s2292_s29 = sshll.u32 %s637_s4, 4  ;;  %s2293_s29 = int_to_ptr.vmem [resolvable:$true] %s2292_s29 }
 0x839   : > { %s3691_s26 = sld [smem:[#allocation7_spill]]  ;;  %s2992_s3 = scalar_lea.vmem %s2293_s29, 128 }
 0x83a   : > { %s3693_s16 = sld [smem:[#allocation27_spill]]  ;;  %p2993_p2 = scmp.ne.s32.totalorder %s2293_s29, %s2992_s3 }
 0x83b   : > { %s3089_s18 = smov [#allocation3]  }
 0x83c   : > { %p2994_p4 = pnand %p2993_p2, %p3214_p3  ;;  %s2996_s5 = sshll.u32 %s3089_s18, 4  ;;  %s2997_s5 = int_to_ptr.vmem [resolvable:$false] %s2996_s5 }
 0x83d   : > { %s2998_s21 = scalar_lea.vmem %s2997_s5, 256  ;;  %p2999_p6 = scmp.lt.s32.totalorder %s2293_s29, %s2997_s5 }
 0x83e   : > { %s2585_s20 = sshll.u32 %s3690_s22, 7  ;;  %p2995_p5 = pneg %p2994_p4 }
 0x83f   : > { %s3695_s14 = sand.u32 1, %s3691_s26   ;;  %p3000_p7 = scmp.lt.s32.totalorder %s2998_s21, %s2992_s3 }
 0x840   : > { %s3694_s24 = smov %s3693_s16  ;;  %s2290_s15 = scalar_lea.hbm %s3693_s16, %s2585_s20 }
 0x841   : > { %s2279_s0 = scalar_lea.sflag [#allocation4], %s3695_s14  ;;  %p3001_p8 = por %p3000_p7, %p2999_p6 }
 0x843   : > { %p3002_p10 = pnand %p3001_p8, %p2995_p5 }
 0x845   : > { %3005 = shalt.err (!%p3002_p10)
}
 0x846   : > { %s3006_s27 = scalar_lea.hbm %s2290_s15, 128  ;;  %s3010_s6 = scalar_lea.hbm %s3694_s24, 256 }
 0x847   : > { %p3007_p11 = scmp.ne.s32.totalorder %s2290_s15, %s3006_s27  ;;  %p3011_p0 = scmp.lt.s32.totalorder %s2290_s15, %s3694_s24 }
 0x848   : > { %p3012_p1 = scmp.lt.s32.totalorder %s3010_s6, %s3006_s27 }
 0x849   : > { %p3008_p12 = pnand %p3007_p11, %p3214_p3 }
 0x84a   : > { %p3013_p2 = por %p3012_p1, %p3011_p0 }
 0x84b   : > { %p3009_p13 = pneg %p3008_p12 }
 0x84d   : > { %p3014_p4 = pnand %p3013_p2, %p3009_p13 }
 0x84f   : > { %3017 = shalt.err (!%p3014_p4)
}
 0x850   : > { %2862 = dma.vmem_to_hbm [thread:$0]  (%p3214_p3), %s2293_s29, 128, %s2290_s15, %s2279_s0  }
 0x851 PF: > { %s3696_s25 = sld [smem:[#allocation13_spill]] }
 0x852   : > { %s3697_s22 = sld [smem:[#allocation6_spill]] }
 0x857   : > { %p2868_p5 = scmp.ge.s32.totalorder %s3696_s25, 2 }
 0x858   : > { %s2304_s20 = sand.u32 1, %s3697_s22  }
 0x859   : > { %p2865_p6 = pnand %p2868_p5, %p3224_p9  ;;  %s2305_s13 = scalar_lea.sflag [#allocation4], %s2304_s20 }
 0x85b   : > { %p2866_p7 = pneg %p2865_p6 }
 0x85d   : > { %3051 = dma.done.wait (%p2866_p7), %s2305_s13, 128  }
 0x85e   : > { %3053 = vsyncadd (%p2866_p7), %s2305_s13, 4294967168  ;;  %s27_s20 = sadd.s32 1, %s3696_s25   ;;  %s3699_s29 = sld [smem:[#allocation7_spill]] }
 0x85f   : > { %p24_p8 = scmp.ge.s32.totalorder %s27_s20, 6   ;;  %s3700_s30 = sld [smem:[#allocation8_spill]] }
 0x860   : > { %s3701_s15 = sld [smem:[#allocation18_spill]] }
 0x861   : > { %s3702_s16 = sld [smem:[#allocation11_spill]]  ;;  %26 = sbr.rel (!%p24_p8) target bundleno = 13 (0xd), region = 158 }
 0x862   : > { %s3703_s17 = sld [smem:[#allocation12_spill]] }
 0x863   : > { %s3704_s18 = sld [smem:[#allocation14_spill]] }
 0x864   : > { %s3705_s19 = sld [smem:[#allocation16_spill]] }
 0x866   :  { %2310 = vsyncpa [#allocation4], 1 }
 0x867   :  { %2312 = vsyncpa [#allocation4 + $0x1], 1 }

</bundles_post_ra>
